<compile_context>
chip_gen: v7x
topology: tpu7x:2x2x1
jax: 0.10.0
libtpu: 0.0.40
codegen_flags: <defaults>
</compile_context>

<pallas_src>
import functools

import jax
import jax.numpy as jnp
from jax.experimental import pallas as pl
from jax.experimental.pallas import tpu as pltpu


# ---------------------------------------------------------------------------
# Pallas kernel: transposed matmul with fused bias + LeakyReLU.
#   w_T      : (Cout, Kdim)  bf16, resident across the M grid
#   patches_T: (Kdim, M)     bf16, tiled along M (lanes)
#   bias     : (Cout, 1)     f32
#   out_T    : (Cout, M)     f32
# ---------------------------------------------------------------------------
def _matmul_bias_act_kernel(w_ref, x_ref, b_ref, o_ref, *, negative_slope):
    y = jnp.dot(w_ref[...], x_ref[...], preferred_element_type=jnp.float32)
    y = y + b_ref[...]                       # f32 epilogue (v5e-safe)
    if negative_slope is not None:           # fused LeakyReLU
        y = jnp.where(y > 0, y, negative_slope * y)
    o_ref[...] = y


def matmul_bias_act(w_T, patches_T, bias_col, negative_slope):
    Cout, Kdim = w_T.shape
    M = patches_T.shape[1]
    # Largest lane-dense tile; (patches + out) double-buffers stay ~3 MiB,
    # well under the scoped-VMEM budget on every TPU generation.
    TM = 512 if (M >= 512 and M % 512 == 0) else M
    grid = (M // TM,)

    kernel = functools.partial(_matmul_bias_act_kernel,
                               negative_slope=negative_slope)
    cost = pl.CostEstimate(
        flops=2 * M * Kdim * Cout,
        transcendentals=0,
        bytes_accessed=(Cout * Kdim * 2 + Kdim * M * 2
                        + Cout * 4 + Cout * M * 4),
    )
    return pl.pallas_call(
        kernel,
        out_shape=jax.ShapeDtypeStruct((Cout, M), jnp.float32),
        grid=grid,
        in_specs=[
            pl.BlockSpec((Cout, Kdim), lambda i: (0, 0)),   # weight, resident
            pl.BlockSpec((Kdim, TM), lambda i: (0, i)),     # M-tiled patches
            pl.BlockSpec((Cout, 1), lambda i: (0, 0)),      # bias column
        ],
        out_specs=pl.BlockSpec((Cout, TM), lambda i: (0, i)),
        compiler_params=pltpu.CompilerParams(
            dimension_semantics=("parallel",),      # 2 TCs on v7x
            vmem_limit_bytes=32 * 1024 * 1024,      # explicit, fits all gens
        ),
        cost_estimate=cost,
    )(w_T, patches_T, bias_col)


# ---------------------------------------------------------------------------
# Glue (plain JAX): transposed im2col, spectral norm, layer wrapper.
# ---------------------------------------------------------------------------
def _im2col_T(x_cnhw, K, stride, padding):
    # x: (C, N, H, W).  Returns patches_T of shape (K*K*C, N*Ho*Wo) with row
    # order (kh, kw, c) and column order (n, oh, ow).
    C, N, H, W = x_cnhw.shape
    if padding > 0:
        x_cnhw = jnp.pad(
            x_cnhw, ((0, 0), (0, 0), (padding, padding), (padding, padding)))
    Hp, Wp = H + 2 * padding, W + 2 * padding
    Ho = (Hp - K) // stride + 1
    Wo = (Wp - K) // stride + 1
    rows = []
    for kh in range(K):
        for kw in range(K):
            win = x_cnhw[:, :,
                         kh:kh + stride * (Ho - 1) + 1:stride,
                         kw:kw + stride * (Wo - 1) + 1:stride]
            rows.append(win.reshape(C, N * Ho * Wo))
    patches_T = jnp.stack(rows, axis=0).reshape(K * K * C, N * Ho * Wo)
    return patches_T, N, Ho, Wo


def spectral_normalize(w, n_iters=16):
    # TODO(synk): PyTorch spectral_norm keeps persistent (u, v) buffers and does
    # one power-iteration step per forward; here we run a fixed number of steps
    # from a deterministic start (converges to the exact sigma), avoiding SVD.
    w2d = w.reshape(w.shape[0], -1)
    v0 = jnp.full((w2d.shape[1],), 1.0 / jnp.sqrt(w2d.shape[1]), w2d.dtype)

    def body(_, v):
        u = w2d @ v
        u = u / (jnp.linalg.norm(u) + 1e-12)
        v = w2d.T @ u
        return v / (jnp.linalg.norm(v) + 1e-12)

    v = jax.lax.fori_loop(0, n_iters, body, v0)
    sigma = jnp.linalg.norm(w2d @ v)
    return w / sigma


def conv2d_layer(x_cnhw, w, b, stride, padding, negative_slope):
    # w: (Cout, Cin, K, K) torch layout; b: (Cout,).  I/O layout is (C, N, H, W).
    Cout, Cin, K, _ = w.shape
    patches_T, N, Ho, Wo = _im2col_T(x_cnhw.astype(jnp.bfloat16),
                                     K, stride, padding)
    # patches row order is (kh, kw, cin) -> permute weight columns to match.
    w_T = jnp.transpose(w, (0, 2, 3, 1)).reshape(Cout, K * K * Cin)
    out_T = matmul_bias_act(w_T.astype(jnp.bfloat16), patches_T,
                            b.reshape(Cout, 1).astype(jnp.float32),
                            negative_slope)
    return out_T.reshape(Cout, N, Ho, Wo)


def single_disc_forward(x_nchw, params):
    x = jnp.transpose(x_nchw, (1, 0, 2, 3))          # NCHW -> (C, N, H, W)
    # FrontEncoder: channels [2,16,32,64,64], k=4, strides [2,2,2,1],
    # paddings [1,1,1,0], each spectral-norm conv + LeakyReLU(0.2).
    strides = [2, 2, 2, 1]
    paddings = [1, 1, 1, 0]
    for i in range(4):
        w = spectral_normalize(params[f"enc{i}_w"])
        x = conv2d_layer(x, w, params[f"enc{i}_b"],
                         strides[i], paddings[i], negative_slope=0.2)
    # fc: plain Conv2d(64 -> 1, k=4, s=1, p=0), no activation, no spectral norm
    x = conv2d_layer(x, params["fc_w"], params["fc_b"],
                     stride=1, padding=0, negative_slope=None)
    return jnp.transpose(x, (1, 0, 2, 3))            # (C,N,H,W) -> NCHW


def init_params(key, in_channels=2):
    channel_list = [in_channels, 16, 32, 64, 64]
    params = {}
    keys = jax.random.split(key, 10)
    for i in range(4):
        cin, cout = channel_list[i], channel_list[i + 1]
        fan_in = cin * 4 * 4
        params[f"enc{i}_w"] = (jax.random.normal(keys[2 * i],
                                                 (cout, cin, 4, 4),
                                                 jnp.float32)
                               / jnp.sqrt(fan_in))
        params[f"enc{i}_b"] = 0.01 * jax.random.normal(keys[2 * i + 1],
                                                       (cout,), jnp.float32)
    fan_in = 64 * 4 * 4
    params["fc_w"] = (jax.random.normal(keys[8], (1, 64, 4, 4), jnp.float32)
                      / jnp.sqrt(fan_in))
    params["fc_b"] = 0.01 * jax.random.normal(keys[9], (1,), jnp.float32)
    return params


if __name__ == "__main__":
    key = jax.random.PRNGKey(0)
    kx, kp = jax.random.split(key)
    # batch=2, in_channels=2, 64x64 input -> output (2, 1, 2, 2)
    x = jax.random.normal(kx, (2, 2, 64, 64), jnp.float32)   # NCHW
    params = init_params(kp, in_channels=2)

    fwd = jax.jit(single_disc_forward)
    out = fwd(x, params)
    jax.block_until_ready(out)
    assert out.shape == (2, 1, 2, 2), out.shape
    assert out.dtype == jnp.float32
    print("KERNEL_OK")
</pallas_src>

<mosaic_0001>
module attributes {stable_mosaic.version = 11 : i64} {
  func.func @_matmul_bias_act_kernel(%arg0: i32, %arg1: memref<16x32xbf16, #tpu.memory_space<vmem>>, %arg2: memref<32x512xbf16, #tpu.memory_space<vmem>>, %arg3: memref<16x1xf32, #tpu.memory_space<vmem>>, %arg4: memref<16x512xf32, #tpu.memory_space<vmem>>) attributes {dimension_semantics = [#tpu.dimension_semantics<parallel>], iteration_bounds = array<i64: 4>, scalar_prefetch = 0 : i64, scratch_operands = 0 : i64, tpu.core_type = #tpu.core_type<tc>, window_params = [{pipeline_mode = #tpu.pipeline_mode<synchronous>, transform_indices = @transform_0, window_bounds = array<i64: 16, 32>}, {transform_indices = @transform_1, window_bounds = array<i64: 32, 512>}, {pipeline_mode = #tpu.pipeline_mode<synchronous>, transform_indices = @transform_2, window_bounds = array<i64: 16, 1>}, {transform_indices = @transform_3, window_bounds = array<i64: 16, 512>}]} {
    %c0 = arith.constant 0 : index
    %c0_0 = arith.constant 0 : index
    %0 = vector.load %arg1[%c0, %c0_0] : memref<16x32xbf16, #tpu.memory_space<vmem>>, vector<16x32xbf16>
    %c0_1 = arith.constant 0 : index
    %c0_2 = arith.constant 0 : index
    %1 = vector.load %arg2[%c0_1, %c0_2] : memref<32x512xbf16, #tpu.memory_space<vmem>>, vector<32x512xbf16>
    %cst = arith.constant dense<0.000000e+00> : vector<16x512xf32>
    %2 = tpu.matmul %0, %1, %cst {dimension_numbers = #tpu.dot_dimension_numbers<[1], [0], [0], [1], [0, 0, 1, 1], [], []>} : vector<16x32xbf16>, vector<32x512xbf16>, vector<16x512xf32> -> vector<16x512xf32>
    %c0_3 = arith.constant 0 : index
    %c0_4 = arith.constant 0 : index
    %3 = vector.load %arg3[%c0_3, %c0_4] : memref<16x1xf32, #tpu.memory_space<vmem>>, vector<16x1xf32>
    %4 = vector.broadcast %3 : vector<16x1xf32> to vector<16x512xf32>
    %5 = arith.addf %2, %4 : vector<16x512xf32>
    %cst_5 = arith.constant 0.000000e+00 : f32
    %6 = vector.broadcast %cst_5 : f32 to vector<16x512xf32>
    %7 = arith.cmpf ogt, %5, %6 : vector<16x512xf32>
    %cst_6 = arith.constant 2.000000e-01 : f32
    %8 = vector.broadcast %cst_6 : f32 to vector<16x512xf32>
    %9 = arith.mulf %8, %5 : vector<16x512xf32>
    %10 = arith.select %7, %5, %9 : vector<16x512xi1>, vector<16x512xf32>
    %c0_7 = arith.constant 0 : index
    %c0_8 = arith.constant 0 : index
    %11 = vector.load %arg4[%c0_7, %c0_8] : memref<16x512xf32, #tpu.memory_space<vmem>>, vector<16x512xf32>
    tpu.vector_store %arg4[%c0_7, %c0_8], %10 {strides = array<i32>} : memref<16x512xf32, #tpu.memory_space<vmem>>, vector<16x512xf32>,
    return
  }
  func.func @transform_0(%arg0: i32) -> (i32, i32) {
    %c0_i32 = arith.constant 0 : i32
    %c0_i32_0 = arith.constant 0 : i32
    %c0_i32_1 = arith.constant 0 : i32
    return %c0_i32, %c0_i32_0 : i32, i32
  }
  func.func @transform_1(%arg0: i32) -> (i32, i32) {
    %c0_i32 = arith.constant 0 : i32
    %c0_i32_0 = arith.constant 0 : i32
    return %c0_i32, %arg0 : i32, i32
  }
  func.func @transform_2(%arg0: i32) -> (i32, i32) {
    %c0_i32 = arith.constant 0 : i32
    %c0_i32_0 = arith.constant 0 : i32
    %c0_i32_1 = arith.constant 0 : i32
    return %c0_i32, %c0_i32_0 : i32, i32
  }
  func.func @transform_3(%arg0: i32) -> (i32, i32) {
    %c0_i32 = arith.constant 0 : i32
    %c0_i32_0 = arith.constant 0 : i32
    return %c0_i32, %arg0 : i32, i32
  }
}

module attributes {stable_mosaic.version = 11 : i64} {
  func.func @_matmul_bias_act_kernel(%arg0: i32, %arg1: memref<32x256xbf16, #tpu.memory_space<vmem>>, %arg2: memref<256x512xbf16, #tpu.memory_space<vmem>>, %arg3: memref<32x1xf32, #tpu.memory_space<vmem>>, %arg4: memref<32x512xf32, #tpu.memory_space<vmem>>) attributes {dimension_semantics = [#tpu.dimension_semantics<parallel>], iteration_bounds = array<i64: 1>, scalar_prefetch = 0 : i64, scratch_operands = 0 : i64, tpu.core_type = #tpu.core_type<tc>, window_params = [{pipeline_mode = #tpu.pipeline_mode<synchronous>, transform_indices = @transform_0, window_bounds = array<i64: 32, 256>}, {transform_indices = @transform_1, window_bounds = array<i64: 256, 512>}, {pipeline_mode = #tpu.pipeline_mode<synchronous>, transform_indices = @transform_2, window_bounds = array<i64: 32, 1>}, {transform_indices = @transform_3, window_bounds = array<i64: 32, 512>}]} {
    %c0 = arith.constant 0 : index
    %c0_0 = arith.constant 0 : index
    %0 = vector.load %arg1[%c0, %c0_0] : memref<32x256xbf16, #tpu.memory_space<vmem>>, vector<32x256xbf16>
    %c0_1 = arith.constant 0 : index
    %c0_2 = arith.constant 0 : index
    %1 = vector.load %arg2[%c0_1, %c0_2] : memref<256x512xbf16, #tpu.memory_space<vmem>>, vector<256x512xbf16>
    %cst = arith.constant dense<0.000000e+00> : vector<32x512xf32>
    %2 = tpu.matmul %0, %1, %cst {dimension_numbers = #tpu.dot_dimension_numbers<[1], [0], [0], [1], [0, 0, 1, 1], [], []>} : vector<32x256xbf16>, vector<256x512xbf16>, vector<32x512xf32> -> vector<32x512xf32>
    %c0_3 = arith.constant 0 : index
    %c0_4 = arith.constant 0 : index
    %3 = vector.load %arg3[%c0_3, %c0_4] : memref<32x1xf32, #tpu.memory_space<vmem>>, vector<32x1xf32>
    %4 = vector.broadcast %3 : vector<32x1xf32> to vector<32x512xf32>
    %5 = arith.addf %2, %4 : vector<32x512xf32>
    %cst_5 = arith.constant 0.000000e+00 : f32
    %6 = vector.broadcast %cst_5 : f32 to vector<32x512xf32>
    %7 = arith.cmpf ogt, %5, %6 : vector<32x512xf32>
    %cst_6 = arith.constant 2.000000e-01 : f32
    %8 = vector.broadcast %cst_6 : f32 to vector<32x512xf32>
    %9 = arith.mulf %8, %5 : vector<32x512xf32>
    %10 = arith.select %7, %5, %9 : vector<32x512xi1>, vector<32x512xf32>
    %c0_7 = arith.constant 0 : index
    %c0_8 = arith.constant 0 : index
    %11 = vector.load %arg4[%c0_7, %c0_8] : memref<32x512xf32, #tpu.memory_space<vmem>>, vector<32x512xf32>
    tpu.vector_store %arg4[%c0_7, %c0_8], %10 {strides = array<i32>} : memref<32x512xf32, #tpu.memory_space<vmem>>, vector<32x512xf32>,
    return
  }
  func.func @transform_0(%arg0: i32) -> (i32, i32) {
    %c0_i32 = arith.constant 0 : i32
    %c0_i32_0 = arith.constant 0 : i32
    %c0_i32_1 = arith.constant 0 : i32
    return %c0_i32, %c0_i32_0 : i32, i32
  }
  func.func @transform_1(%arg0: i32) -> (i32, i32) {
    %c0_i32 = arith.constant 0 : i32
    %c0_i32_0 = arith.constant 0 : i32
    return %c0_i32, %arg0 : i32, i32
  }
  func.func @transform_2(%arg0: i32) -> (i32, i32) {
    %c0_i32 = arith.constant 0 : i32
    %c0_i32_0 = arith.constant 0 : i32
    %c0_i32_1 = arith.constant 0 : i32
    return %c0_i32, %c0_i32_0 : i32, i32
  }
  func.func @transform_3(%arg0: i32) -> (i32, i32) {
    %c0_i32 = arith.constant 0 : i32
    %c0_i32_0 = arith.constant 0 : i32
    return %c0_i32, %arg0 : i32, i32
  }
}

module attributes {stable_mosaic.version = 11 : i64} {
  func.func @_matmul_bias_act_kernel(%arg0: i32, %arg1: memref<64x512xbf16, #tpu.memory_space<vmem>>, %arg2: memref<512x128xbf16, #tpu.memory_space<vmem>>, %arg3: memref<64x1xf32, #tpu.memory_space<vmem>>, %arg4: memref<64x128xf32, #tpu.memory_space<vmem>>) attributes {dimension_semantics = [#tpu.dimension_semantics<parallel>], iteration_bounds = array<i64: 1>, scalar_prefetch = 0 : i64, scratch_operands = 0 : i64, tpu.core_type = #tpu.core_type<tc>, window_params = [{pipeline_mode = #tpu.pipeline_mode<synchronous>, transform_indices = @transform_0, window_bounds = array<i64: 64, 512>}, {transform_indices = @transform_1, window_bounds = array<i64: 512, 128>}, {pipeline_mode = #tpu.pipeline_mode<synchronous>, transform_indices = @transform_2, window_bounds = array<i64: 64, 1>}, {transform_indices = @transform_3, window_bounds = array<i64: 64, 128>}]} {
    %c0 = arith.constant 0 : index
    %c0_0 = arith.constant 0 : index
    %0 = vector.load %arg1[%c0, %c0_0] : memref<64x512xbf16, #tpu.memory_space<vmem>>, vector<64x512xbf16>
    %c0_1 = arith.constant 0 : index
    %c0_2 = arith.constant 0 : index
    %1 = vector.load %arg2[%c0_1, %c0_2] : memref<512x128xbf16, #tpu.memory_space<vmem>>, vector<512x128xbf16>
    %cst = arith.constant dense<0.000000e+00> : vector<64x128xf32>
    %2 = tpu.matmul %0, %1, %cst {dimension_numbers = #tpu.dot_dimension_numbers<[1], [0], [0], [1], [0, 0, 1, 1], [], []>} : vector<64x512xbf16>, vector<512x128xbf16>, vector<64x128xf32> -> vector<64x128xf32>
    %c0_3 = arith.constant 0 : index
    %c0_4 = arith.constant 0 : index
    %3 = vector.load %arg3[%c0_3, %c0_4] : memref<64x1xf32, #tpu.memory_space<vmem>>, vector<64x1xf32>
    %4 = vector.broadcast %3 : vector<64x1xf32> to vector<64x128xf32>
    %5 = arith.addf %2, %4 : vector<64x128xf32>
    %cst_5 = arith.constant 0.000000e+00 : f32
    %6 = vector.broadcast %cst_5 : f32 to vector<64x128xf32>
    %7 = arith.cmpf ogt, %5, %6 : vector<64x128xf32>
    %cst_6 = arith.constant 2.000000e-01 : f32
    %8 = vector.broadcast %cst_6 : f32 to vector<64x128xf32>
    %9 = arith.mulf %8, %5 : vector<64x128xf32>
    %10 = arith.select %7, %5, %9 : vector<64x128xi1>, vector<64x128xf32>
    %c0_7 = arith.constant 0 : index
    %c0_8 = arith.constant 0 : index
    %11 = vector.load %arg4[%c0_7, %c0_8] : memref<64x128xf32, #tpu.memory_space<vmem>>, vector<64x128xf32>
    tpu.vector_store %arg4[%c0_7, %c0_8], %10 {strides = array<i32>} : memref<64x128xf32, #tpu.memory_space<vmem>>, vector<64x128xf32>,
    return
  }
  func.func @transform_0(%arg0: i32) -> (i32, i32) {
    %c0_i32 = arith.constant 0 : i32
    %c0_i32_0 = arith.constant 0 : i32
    %c0_i32_1 = arith.constant 0 : i32
    return %c0_i32, %c0_i32_0 : i32, i32
  }
  func.func @transform_1(%arg0: i32) -> (i32, i32) {
    %c0_i32 = arith.constant 0 : i32
    %c0_i32_0 = arith.constant 0 : i32
    return %c0_i32, %arg0 : i32, i32
  }
  func.func @transform_2(%arg0: i32) -> (i32, i32) {
    %c0_i32 = arith.constant 0 : i32
    %c0_i32_0 = arith.constant 0 : i32
    %c0_i32_1 = arith.constant 0 : i32
    return %c0_i32, %c0_i32_0 : i32, i32
  }
  func.func @transform_3(%arg0: i32) -> (i32, i32) {
    %c0_i32 = arith.constant 0 : i32
    %c0_i32_0 = arith.constant 0 : i32
    return %c0_i32, %arg0 : i32, i32
  }
}

module attributes {stable_mosaic.version = 11 : i64} {
  func.func @_matmul_bias_act_kernel(%arg0: i32, %arg1: memref<64x1024xbf16, #tpu.memory_space<vmem>>, %arg2: memref<1024x50xbf16, #tpu.memory_space<vmem>>, %arg3: memref<64x1xf32, #tpu.memory_space<vmem>>, %arg4: memref<64x50xf32, #tpu.memory_space<vmem>>) attributes {dimension_semantics = [#tpu.dimension_semantics<parallel>], iteration_bounds = array<i64: 1>, scalar_prefetch = 0 : i64, scratch_operands = 0 : i64, tpu.core_type = #tpu.core_type<tc>, window_params = [{pipeline_mode = #tpu.pipeline_mode<synchronous>, transform_indices = @transform_0, window_bounds = array<i64: 64, 1024>}, {transform_indices = @transform_1, window_bounds = array<i64: 1024, 50>}, {pipeline_mode = #tpu.pipeline_mode<synchronous>, transform_indices = @transform_2, window_bounds = array<i64: 64, 1>}, {transform_indices = @transform_3, window_bounds = array<i64: 64, 50>}]} {
    %c0 = arith.constant 0 : index
    %c0_0 = arith.constant 0 : index
    %0 = vector.load %arg1[%c0, %c0_0] : memref<64x1024xbf16, #tpu.memory_space<vmem>>, vector<64x1024xbf16>
    %c0_1 = arith.constant 0 : index
    %c0_2 = arith.constant 0 : index
    %1 = vector.load %arg2[%c0_1, %c0_2] : memref<1024x50xbf16, #tpu.memory_space<vmem>>, vector<1024x50xbf16>
    %cst = arith.constant dense<0.000000e+00> : vector<64x50xf32>
    %2 = tpu.matmul %0, %1, %cst {dimension_numbers = #tpu.dot_dimension_numbers<[1], [0], [0], [1], [0, 0, 1, 1], [], []>} : vector<64x1024xbf16>, vector<1024x50xbf16>, vector<64x50xf32> -> vector<64x50xf32>
    %c0_3 = arith.constant 0 : index
    %c0_4 = arith.constant 0 : index
    %3 = vector.load %arg3[%c0_3, %c0_4] : memref<64x1xf32, #tpu.memory_space<vmem>>, vector<64x1xf32>
    %4 = vector.broadcast %3 : vector<64x1xf32> to vector<64x50xf32>
    %5 = arith.addf %2, %4 : vector<64x50xf32>
    %cst_5 = arith.constant 0.000000e+00 : f32
    %6 = vector.broadcast %cst_5 : f32 to vector<64x50xf32>
    %7 = arith.cmpf ogt, %5, %6 : vector<64x50xf32>
    %cst_6 = arith.constant 2.000000e-01 : f32
    %8 = vector.broadcast %cst_6 : f32 to vector<64x50xf32>
    %9 = arith.mulf %8, %5 : vector<64x50xf32>
    %10 = arith.select %7, %5, %9 : vector<64x50xi1>, vector<64x50xf32>
    %c0_7 = arith.constant 0 : index
    %c0_8 = arith.constant 0 : index
    %11 = vector.load %arg4[%c0_7, %c0_8] : memref<64x50xf32, #tpu.memory_space<vmem>>, vector<64x50xf32>
    tpu.vector_store %arg4[%c0_7, %c0_8], %10 {strides = array<i32>} : memref<64x50xf32, #tpu.memory_space<vmem>>, vector<64x50xf32>,
    return
  }
  func.func @transform_0(%arg0: i32) -> (i32, i32) {
    %c0_i32 = arith.constant 0 : i32
    %c0_i32_0 = arith.constant 0 : i32
    %c0_i32_1 = arith.constant 0 : i32
    return %c0_i32, %c0_i32_0 : i32, i32
  }
  func.func @transform_1(%arg0: i32) -> (i32, i32) {
    %c0_i32 = arith.constant 0 : i32
    %c0_i32_0 = arith.constant 0 : i32
    return %c0_i32, %arg0 : i32, i32
  }
  func.func @transform_2(%arg0: i32) -> (i32, i32) {
    %c0_i32 = arith.constant 0 : i32
    %c0_i32_0 = arith.constant 0 : i32
    %c0_i32_1 = arith.constant 0 : i32
    return %c0_i32, %c0_i32_0 : i32, i32
  }
  func.func @transform_3(%arg0: i32) -> (i32, i32) {
    %c0_i32 = arith.constant 0 : i32
    %c0_i32_0 = arith.constant 0 : i32
    return %c0_i32, %arg0 : i32, i32
  }
}

module attributes {stable_mosaic.version = 11 : i64} {
  func.func @_matmul_bias_act_kernel(%arg0: i32, %arg1: memref<1x1024xbf16, #tpu.memory_space<vmem>>, %arg2: memref<1024x8xbf16, #tpu.memory_space<vmem>>, %arg3: memref<1x1xf32, #tpu.memory_space<vmem>>, %arg4: memref<1x8xf32, #tpu.memory_space<vmem>>) attributes {dimension_semantics = [#tpu.dimension_semantics<parallel>], iteration_bounds = array<i64: 1>, scalar_prefetch = 0 : i64, scratch_operands = 0 : i64, tpu.core_type = #tpu.core_type<tc>, window_params = [{pipeline_mode = #tpu.pipeline_mode<synchronous>, transform_indices = @transform_0, window_bounds = array<i64: 1, 1024>}, {transform_indices = @transform_1, window_bounds = array<i64: 1024, 8>}, {pipeline_mode = #tpu.pipeline_mode<synchronous>, transform_indices = @transform_2, window_bounds = array<i64: 1, 1>}, {transform_indices = @transform_3, window_bounds = array<i64: 1, 8>}]} {
    %c0 = arith.constant 0 : index
    %c0_0 = arith.constant 0 : index
    %0 = vector.load %arg1[%c0, %c0_0] : memref<1x1024xbf16, #tpu.memory_space<vmem>>, vector<1x1024xbf16>
    %c0_1 = arith.constant 0 : index
    %c0_2 = arith.constant 0 : index
    %1 = vector.load %arg2[%c0_1, %c0_2] : memref<1024x8xbf16, #tpu.memory_space<vmem>>, vector<1024x8xbf16>
    %cst = arith.constant dense<0.000000e+00> : vector<1x8xf32>
    %2 = tpu.matmul %0, %1, %cst {dimension_numbers = #tpu.dot_dimension_numbers<[1], [0], [0], [1], [0, 0, 1, 1], [], []>} : vector<1x1024xbf16>, vector<1024x8xbf16>, vector<1x8xf32> -> vector<1x8xf32>
    %c0_3 = arith.constant 0 : index
    %c0_4 = arith.constant 0 : index
    %3 = vector.load %arg3[%c0_3, %c0_4] : memref<1x1xf32, #tpu.memory_space<vmem>>, vector<1x1xf32>
    %4 = vector.broadcast %3 : vector<1x1xf32> to vector<1x8xf32>
    %5 = arith.addf %2, %4 : vector<1x8xf32>
    %c0_5 = arith.constant 0 : index
    %c0_6 = arith.constant 0 : index
    %6 = vector.load %arg4[%c0_5, %c0_6] : memref<1x8xf32, #tpu.memory_space<vmem>>, vector<1x8xf32>
    tpu.vector_store %arg4[%c0_5, %c0_6], %5 {strides = array<i32>} : memref<1x8xf32, #tpu.memory_space<vmem>>, vector<1x8xf32>,
    return
  }
  func.func @transform_0(%arg0: i32) -> (i32, i32) {
    %c0_i32 = arith.constant 0 : i32
    %c0_i32_0 = arith.constant 0 : i32
    %c0_i32_1 = arith.constant 0 : i32
    return %c0_i32, %c0_i32_0 : i32, i32
  }
  func.func @transform_1(%arg0: i32) -> (i32, i32) {
    %c0_i32 = arith.constant 0 : i32
    %c0_i32_0 = arith.constant 0 : i32
    return %c0_i32, %arg0 : i32, i32
  }
  func.func @transform_2(%arg0: i32) -> (i32, i32) {
    %c0_i32 = arith.constant 0 : i32
    %c0_i32_0 = arith.constant 0 : i32
    %c0_i32_1 = arith.constant 0 : i32
    return %c0_i32, %c0_i32_0 : i32, i32
  }
  func.func @transform_3(%arg0: i32) -> (i32, i32) {
    %c0_i32 = arith.constant 0 : i32
    %c0_i32_0 = arith.constant 0 : i32
    return %c0_i32, %arg0 : i32, i32
  }
}

</mosaic_0001>

<bundles_post_ra>
// kernel: custom-call
= control target key start
LH: loop header
LB: loop body
LE: loop exit
PB: predicated region body
PF: predicated region fallthrough
CT: control target
= control target key end

     0   :  { %s6_s0 = inlined_call_operand.vmem [shape: f32[32], index: 0, kind: output, shape index: {}]  }

// kernel: single_disc_forward.5
= control target key start
LH: loop header
LB: loop body
LE: loop exit
PB: predicated region body
PF: predicated region fallthrough
CT: control target
= control target key end

     0   :  { %s600_s12 = smov 0   ;;  %s602_s13 = smov 0   ;;  %s691_s0 = inlined_call_operand.vmem [shape: bf16[16,32], index: 0, kind: input, shape index: {}]   ;;  %s692_s1 = inlined_call_operand.vmem [shape: bf16[32,2048], index: 1, kind: input, shape index: {}]   ;;  %s693_s2 = inlined_call_operand.vmem [shape: f32[16,1], index: 2, kind: input, shape index: {}]   ;;  %s694_s3 = inlined_call_operand.vmem [shape: f32[16,2048], index: 3, kind: output, shape index: {}]  }
   0x1   :  { %s604_s14 = smov 0  }
   0x2 LB: > { %s488_s15 = sadd.s32 4294967295, %s577_s14   ;;  %s617_s16 = sadd.s32 1, %s577_s14   ;;  %s577_s14 = sphi %s604_s14, %s698_s14   ;;  %s573_s13 = sphi %s602_s13, %s697_s13   ;;  %s569_s12 = sphi %s600_s12, %s696_s12  }
   0x3   : > { %s38_s17 = ssub.s32 %s577_s14, %s617_s16  ;;  %s41_s18 = sadd.s32 1, %s573_s13 }
   0x4   : > { %p39_p0 = scmp.eq.s32.totalorder %s38_s17, 0  ;;  %p48_p1 = scmp.ne.s32.totalorder %s573_s13, %s569_s12 }
   0x5   : > { %p49_p2 = scmp.eq.s32.totalorder %s577_s14, 0  ;;  %p99_p3 = scmp.eq.s32.totalorder %s488_s15, 3 }
   0x6   : > { %s628_s19 = scalar_select %p39_p0, %s573_s13, %s41_s18  }
   0x7   : > { %p50_p4 = por %p49_p2, %p48_p1  ;;  %p630_p5 = por %p99_p3, %p48_p1 }
   0x8   : > { %p491_p6 = scmp.ge.s32.totalorder %s577_s14, 4 }
   0xa   : > { %127 = sbr.rel (%p491_p6) target bundleno = 25 (0x19), region = 24 }
  0x11   : > { %130 = sbr.rel (!%p50_p4) target bundleno = 25 (0x19), region = 28  ;;  %s132_s21 = sand.u32 (%p50_p4), 1, %s573_s13  }
  0x12   : > { %s514_s22 = sshll.u32 (%p50_p4), %s577_s14, 4  ;;  %s492_s23 = sshll.u32 (%p50_p4), %s132_s21, 6 }
  0x13   : > { %s137_s26 = scalar_lea.vmem (%p50_p4), %s692_s1, %s514_s22  ;;  %s134_s27 = scalar_lea.vmem (%p50_p4), [#allocation2], %s492_s23 }
  0x14   : > { %v150_v0 = vld [vmem:[%s137_s26] sm:$0xff] (%p50_p4)  ;;  %v152_v1 = vld [vmem:[%s137_s26 + $0x8] sm:$0xff] (%p50_p4) }
  0x15   : > { %v154_v2 = vld [vmem:[%s137_s26 + $0x40] sm:$0xff] (%p50_p4)  ;;  %151 = vst [vmem:[%s134_s27] sm:$0xff] (%p50_p4), %v150_v0  ;;  %153 = vst [vmem:[%s134_s27 + $0x8] sm:$0xff] (%p50_p4), %v152_v1  ;;  %v156_v3 = vld [vmem:[%s137_s26 + $0x48] sm:$0xff] (%p50_p4) }
  0x16   : > { %155 = vst [vmem:[%s134_s27 + $0x10] sm:$0xff] (%p50_p4), %v154_v2  ;;  %v158_v4 = vld [vmem:[%s137_s26 + $0x80] sm:$0xff] (%p50_p4)  ;;  %v160_v5 = vld [vmem:[%s137_s26 + $0x88] sm:$0xff] (%p50_p4)  ;;  %157 = vst [vmem:[%s134_s27 + $0x18] sm:$0xff] (%p50_p4), %v156_v3 }
  0x17   : > { %159 = vst [vmem:[%s134_s27 + $0x20] sm:$0xff] (%p50_p4), %v158_v4  ;;  %161 = vst [vmem:[%s134_s27 + $0x28] sm:$0xff] (%p50_p4), %v160_v5  ;;  %v162_v6 = vld [vmem:[%s137_s26 + $0xc0] sm:$0xff] (%p50_p4)  ;;  %v164_v7 = vld [vmem:[%s137_s26 + $0xc8] sm:$0xff] (%p50_p4) }
  0x18   : > { %163 = vst [vmem:[%s134_s27 + $0x30] sm:$0xff] %v162_v6  ;;  %165 = vst [vmem:[%s134_s27 + $0x38] sm:$0xff] %v164_v7 }
  0x19 PF: > { %p495_p7 = scmp.ge.s32.totalorder %s577_s14, 1  ;;  %p170_p8 = scmp.lt.s32.totalorder %s577_s14, 5 }
  0x1b   : > { %p171_p9 = pnand %p495_p7, %p170_p8 }
  0x1c   : > { %s177_s28 = sand.u32 (!%p171_p9), 1, %s569_s12   ;;  %v579_v8 = vmov (!%p171_p9), 0   ;;  %v212_v9 = vld [vmem:[%s693_s2] sm:$0xff] (!%p171_p9)  ;;  %v213_v11 = vld [vmem:[%s693_s2 + $0x8] sm:$0xff] (!%p171_p9)  ;;  %vm269_vm0 = vcmask (!%p171_p9), 261120  }
  0x1d   : > { %174 = sbr.rel (%p171_p9) target bundleno = 272 (0x110), region = 51  ;;  %s643_s29 = sshll.u32 (!%p171_p9), %s177_s28, 6  ;;  %305 = vmatprep.mubr.bf16.mxu0 (!%p171_p9), %v579_v8  ;;  %348 = vmatprep.mubr.bf16.mxu1 (!%p171_p9), %v579_v8  ;;  %v554_v19 = vld [vmem:[%s691_s0] sm:$0xff] (!%p171_p9)  }
  0x1e   : > { %541 = vset.pattern.permute.xlu0 (!%p171_p9), %v579_v8  ;;  %s179_s5 = scalar_lea.vmem (!%p171_p9), [#allocation2], %s643_s29  ;;  %s656_s10 = scalar_lea.vmem (!%p171_p9), [#allocation3], %s643_s29 }
  0x1f   : > { %v542_v10 = vld [vmem:[%s179_s5 + $0x4] ss:$16 sps:$4 sm:$0xff] (!%p171_p9)   ;;  %216 = vperm.xlu0 (!%p171_p9), %541, %v212_v9   ;;  %v544_v12 = vld [vmem:[%s179_s5 + $0xc] ss:$16 sps:$4 sm:$0xff] (!%p171_p9)   ;;  %v546_v13 = vld [vmem:[%s179_s5] ss:$16 sps:$4 sm:$0xff] (!%p171_p9)  }
  0x20   : > { %273 = vmatprep.subr.bf16.mxu0 (!%p171_p9), %v542_v10  ;;  %v547_v14 = vld [vmem:[%s179_s5 + $0x8] ss:$16 sps:$4 sm:$0xff] (!%p171_p9)   ;;  %316 = vmatprep.subr.bf16.mxu1 (!%p171_p9), %v544_v12  ;;  %v548_v15 = vld [vmem:[%s179_s5 + $0x24] ss:$16 sps:$4 sm:$0xff] (!%p171_p9)   ;;  %v550_v16 = vld [vmem:[%s179_s5 + $0x2c] ss:$16 sps:$4 sm:$0xff] (!%p171_p9)  }
  0x21   : > { %274 = vmatpush1.bf16.msra.mxu0 (!%p171_p9), %v546_v13  ;;  %317 = vmatpush1.bf16.msra.mxu1 (!%p171_p9), %v547_v14  ;;  %v552_v17 = vld [vmem:[%s179_s5 + $0x20] ss:$16 sps:$4 sm:$0xff] (!%p171_p9)   ;;  %v553_v18 = vld [vmem:[%s179_s5 + $0x28] ss:$16 sps:$4 sm:$0xff] (!%p171_p9)  }
  0x22   : > { %275 = vmatprep.subr.bf16.mxu0 (!%p171_p9), %v548_v15  ;;  %318 = vmatprep.subr.bf16.mxu1 (!%p171_p9), %v550_v16 }
  0x23   : > { %221 = vperm.xlu0 (!%p171_p9), %541, %v213_v11  }
  0x24   : > { %s515_s11 = sshll.u32 (%p630_p5), %s488_s15, 5 }
  0x25   : > { %276 = vmatpush1.bf16.msra.mxu0 %v552_v17  ;;  %319 = vmatpush1.bf16.msra.mxu1 %v553_v18  ;;  %s400_s18 = scalar_lea.vmem (%p630_p5), %s694_s3, %s515_s11 }
  0x28   : > { %507 = vmatmul.mubr.msk.bf16.vlgmr.msra.gmra.mrb[0].mxu0 %vm269_vm0, %v554_v19  ;;  %508 = vmatmul.mubr.msk.bf16.vlgmr.msra.gmra.mrb[0].mxu1 %vm269_vm0, %v554_v19 }
  0x9e   : > { %v217_v20 = vpop.permute.xlu0 %216 }
  0xa2   : > { %v222_v33 = vpop.permute.xlu0 %221 }
  0xfb   : > { %v307_v21 = vpop.f32.mrb[0].mxu0  ;;  %v350_v22 = vpop.f32.mrb[0].mxu1 }
  0xfc   : > { %v308_v23 = vadd.f32 %v307_v21, %v217_v20  ;;  %v351_v24 = vadd.f32 %v350_v22, %v217_v20  ;;  %v309_v25 = vpop.f32.mrb[1].mxu0  ;;  %v352_v26 = vpop.f32.mrb[1].mxu1 }
  0xfd   : > { %v310_v27 = vadd.f32 %v309_v25, %v217_v20  ;;  %v353_v28 = vadd.f32 %v352_v26, %v217_v20  ;;  %v311_v29 = vpop.f32.mrb[2].mxu0  ;;  %v354_v30 = vpop.f32.mrb[2].mxu1 }
  0xfe   : > { %vm359_vm1 = vcmp.gt.f32.partialorder %v308_v23, 0.0  ;;  %v367_v31 = vmul.f32 0.2, %v308_v23  ;;  %vm361_vm2 = vcmp.gt.f32.partialorder %v351_v24, 0.0  ;;  %v369_v32 = vmul.f32 0.2, %v351_v24 }
  0xff   : > { %vm360_vm3 = vcmp.gt.f32.partialorder %v310_v27, 0.0  ;;  %v368_v34 = vmul.f32 0.2, %v310_v27  ;;  %vm362_vm4 = vcmp.gt.f32.partialorder %v353_v28, 0.0  ;;  %v370_v35 = vmul.f32 0.2, %v353_v28 }
 0x100   : > { %v375_v36 = vsel %vm359_vm1, %v308_v23, %v367_v31  ;;  %v377_v37 = vsel %vm361_vm2, %v351_v24, %v369_v32  ;;  %v312_v38 = vadd.f32 %v311_v29, %v222_v33  ;;  %v355_v39 = vadd.f32 %v354_v30, %v222_v33  ;;  %v313_v40 = vpop.f32.mrb[3].mxu0  ;;  %v356_v41 = vpop.f32.mrb[3].mxu1 }
 0x101   : > { %383 = vst [vmem:[%s656_s10] sm:$0xff] %v375_v36  ;;  %385 = vst [vmem:[%s656_s10 + $0x10] sm:$0xff] %v377_v37  ;;  %v376_v42 = vsel %vm360_vm3, %v310_v27, %v368_v34  ;;  %v378_v43 = vsel %vm362_vm4, %v353_v28, %v370_v35  ;;  %v314_v44 = vadd.f32 %v313_v40, %v222_v33  ;;  %397 = sbr.rel (!%p630_p5) target bundleno = 272 (0x110), region = 59 }
 0x102   : > { %v357_v45 = vadd.f32 %v356_v41, %v222_v33  ;;  %384 = vst [vmem:[%s656_s10 + $0x8] sm:$0xff] %v376_v42  ;;  %386 = vst [vmem:[%s656_s10 + $0x18] sm:$0xff] %v378_v43  ;;  %vm363_vm5 = vcmp.gt.f32.partialorder %v312_v38, 0.0  ;;  %v371_v46 = vmul.f32 0.2, %v312_v38  ;;  %vm365_vm6 = vcmp.gt.f32.partialorder %v355_v39, 0.0 }
 0x103   : > { %v373_v47 = vmul.f32 0.2, %v355_v39  ;;  %vm364_vm7 = vcmp.gt.f32.partialorder %v314_v44, 0.0  ;;  %v372_v48 = vmul.f32 0.2, %v314_v44 }
 0x104   : > { %vm366_vm8 = vcmp.gt.f32.partialorder %v357_v45, 0.0  ;;  %v374_v49 = vmul.f32 0.2, %v357_v45  ;;  %v379_v50 = vsel %vm363_vm5, %v312_v38, %v371_v46 }
 0x105   : > { %v381_v51 = vsel %vm365_vm6, %v355_v39, %v373_v47  ;;  %387 = vst [vmem:[%s656_s10 + $0x20] sm:$0xff] %v379_v50  ;;  %v380_v52 = vsel %vm364_vm7, %v314_v44, %v372_v48 }
 0x106   : > { %389 = vst [vmem:[%s656_s10 + $0x30] sm:$0xff] %v381_v51  ;;  %v382_v53 = vsel %vm366_vm8, %v357_v45, %v374_v49  ;;  %388 = vst [vmem:[%s656_s10 + $0x28] sm:$0xff] %v380_v52 }
 0x107   : > { %390 = vst [vmem:[%s656_s10 + $0x38] sm:$0xff] %v382_v53 }
 0x108   : > { %v413_v54 = vld [vmem:[%s656_s10] sm:$0xff]  ;;  %v417_v56 = vld [vmem:[%s656_s10 + $0x10] sm:$0xff] }
 0x109   : > { %v415_v55 = vld [vmem:[%s656_s10 + $0x8] sm:$0xff]  ;;  %v419_v57 = vld [vmem:[%s656_s10 + $0x18] sm:$0xff]  ;;  %414 = vst [vmem:[%s400_s18] sm:$0xff] %v413_v54  ;;  %418 = vst [vmem:[%s400_s18 + $0x10] sm:$0xff] %v417_v56 }
 0x10a   : > { %416 = vst [vmem:[%s400_s18 + $0x8] sm:$0xff] %v415_v55  ;;  %420 = vst [vmem:[%s400_s18 + $0x18] sm:$0xff] %v419_v57 }
 0x10c   : > { %v421_v58 = vld [vmem:[%s656_s10 + $0x20] sm:$0xff] }
 0x10d   : > { %v423_v59 = vld [vmem:[%s656_s10 + $0x28] sm:$0xff]  ;;  %422 = vst [vmem:[%s400_s18 + $0x80] sm:$0xff] %v421_v58  ;;  %v425_v60 = vld [vmem:[%s656_s10 + $0x30] sm:$0xff] }
 0x10e   : > { %424 = vst [vmem:[%s400_s18 + $0x88] sm:$0xff] %v423_v59  ;;  %v427_v61 = vld [vmem:[%s656_s10 + $0x38] sm:$0xff]  ;;  %426 = vst [vmem:[%s400_s18 + $0x90] sm:$0xff] %v425_v60 }
 0x10f   : > { %428 = vst [vmem:[%s400_s18 + $0x98] sm:$0xff] %v427_v61 }
 0x110 PF: > { %p10_p10 = scmp.ge.s32.totalorder %s617_s16, 6   ;;  %s696_s12 = smov %s573_s13 }
 0x111   : > { %s697_s13 = smov %s628_s19  ;;  %s698_s14 = smov %s617_s16 }
 0x112   :  { %12 = sbr.rel (!%p10_p10) target bundleno = 2 (0x2), region = 113 }

// kernel: custom-call.1
= control target key start
LH: loop header
LB: loop body
LE: loop exit
PB: predicated region body
PF: predicated region fallthrough
CT: control target
= control target key end

     0   :  { %s6_s0 = inlined_call_operand.vmem [shape: f32[256], index: 0, kind: output, shape index: {}]  }

// kernel: single_disc_forward.6
= control target key start
LH: loop header
LB: loop body
LE: loop exit
PB: predicated region body
PF: predicated region fallthrough
CT: control target
= control target key end

     0   :  { %v793_v1 = vmov 0   ;;  %s1078_s1 = inlined_call_operand.vmem [shape: bf16[256,512], index: 1, kind: input, shape index: {}]   ;;  %s1079_s0 = inlined_call_operand.vmem [shape: bf16[32,256], index: 0, kind: input, shape index: {}]   ;;  %s1080_s2 = inlined_call_operand.vmem [shape: f32[32,1], index: 2, kind: input, shape index: {}]   ;;  %s1081_s3 = inlined_call_operand.vmem [shape: f32[32,512], index: 3, kind: output, shape index: {}]  }
   0x1   :  { %v691_v0 = vld [vmem:[%s1078_s1 + $0x4] ss:$16 sps:$4 sm:$0xff]   ;;  %689 = vset.pattern.permute.xlu0 %v793_v1  ;;  %690 = vset.pattern.permute.xlu1 %v793_v1  ;;  %v693_v2 = vld [vmem:[%s1078_s1 + $0xc] ss:$16 sps:$4 sm:$0xff]   ;;  %v695_v3 = vld [vmem:[%s1078_s1] ss:$16 sps:$4 sm:$0xff]  }
   0x2   :  { %446 = vmatprep.subr.bf16.mxu0 %v691_v0  ;;  %v696_v4 = vld [vmem:[%s1078_s1 + $0x8] ss:$16 sps:$4 sm:$0xff]   ;;  %499 = vmatprep.subr.bf16.mxu1 %v693_v2  ;;  %v697_v5 = vld [vmem:[%s1078_s1 + $0x24] ss:$16 sps:$4 sm:$0xff]   ;;  %v699_v6 = vld [vmem:[%s1078_s1 + $0x2c] ss:$16 sps:$4 sm:$0xff]  }
   0x3   :  { %447 = vmatpush1.bf16.msra.mxu0 %v695_v3  ;;  %500 = vmatpush1.bf16.msra.mxu1 %v696_v4  ;;  %v701_v7 = vld [vmem:[%s1078_s1 + $0x20] ss:$16 sps:$4 sm:$0xff]   ;;  %v702_v8 = vld [vmem:[%s1078_s1 + $0x28] ss:$16 sps:$4 sm:$0xff]   ;;  %v703_v9 = vld [vmem:[%s1078_s1 + $0x44] ss:$16 sps:$4 sm:$0xff]  }
   0x4   :  { %448 = vmatprep.subr.bf16.mxu0 %v697_v5  ;;  %501 = vmatprep.subr.bf16.mxu1 %v699_v6  ;;  %v705_v10 = vld [vmem:[%s1078_s1 + $0x4c] ss:$16 sps:$4 sm:$0xff]   ;;  %v707_v11 = vld [vmem:[%s1078_s1 + $0x40] ss:$16 sps:$4 sm:$0xff]   ;;  %v708_v12 = vld [vmem:[%s1078_s1 + $0x48] ss:$16 sps:$4 sm:$0xff]  }
   0x5   :  { %v709_v13 = vld [vmem:[%s1078_s1 + $0x64] ss:$16 sps:$4 sm:$0xff]   ;;  %v711_v14 = vld [vmem:[%s1078_s1 + $0x6c] ss:$16 sps:$4 sm:$0xff]   ;;  %v713_v15 = vld [vmem:[%s1078_s1 + $0x60] ss:$16 sps:$4 sm:$0xff]  }
   0x6   :  { %v714_v16 = vld [vmem:[%s1078_s1 + $0x68] ss:$16 sps:$4 sm:$0xff]   ;;  %v715_v17 = vld [vmem:[%s1078_s1 + $0x84] ss:$16 sps:$4 sm:$0xff]   ;;  %v717_v18 = vld [vmem:[%s1078_s1 + $0x8c] ss:$16 sps:$4 sm:$0xff]  }
   0x7   :  { %449 = vmatpush1.bf16.msra.mxu0 %v701_v7  ;;  %502 = vmatpush1.bf16.msra.mxu1 %v702_v8  ;;  %v719_v19 = vld [vmem:[%s1078_s1 + $0x80] ss:$16 sps:$4 sm:$0xff]   ;;  %v720_v20 = vld [vmem:[%s1078_s1 + $0x88] ss:$16 sps:$4 sm:$0xff]   ;;  %v721_v21 = vld [vmem:[%s1078_s1 + $0xa4] ss:$16 sps:$4 sm:$0xff]  }
   0x8   :  { %450 = vmatprep.subr.bf16.mxu0 %v703_v9  ;;  %503 = vmatprep.subr.bf16.mxu1 %v705_v10  ;;  %v723_v22 = vld [vmem:[%s1078_s1 + $0xac] ss:$16 sps:$4 sm:$0xff]   ;;  %v725_v23 = vld [vmem:[%s1078_s1 + $0xa0] ss:$16 sps:$4 sm:$0xff]   ;;  %v726_v24 = vld [vmem:[%s1078_s1 + $0xa8] ss:$16 sps:$4 sm:$0xff]  }
   0x9   :  { %v727_v25 = vld [vmem:[%s1078_s1 + $0xc4] ss:$16 sps:$4 sm:$0xff]   ;;  %v729_v26 = vld [vmem:[%s1078_s1 + $0xcc] ss:$16 sps:$4 sm:$0xff]   ;;  %v731_v27 = vld [vmem:[%s1078_s1 + $0xc0] ss:$16 sps:$4 sm:$0xff]  }
   0xa   :  { %v732_v28 = vld [vmem:[%s1078_s1 + $0xc8] ss:$16 sps:$4 sm:$0xff]   ;;  %v733_v29 = vld [vmem:[%s1078_s1 + $0xe4] ss:$16 sps:$4 sm:$0xff]   ;;  %v735_v30 = vld [vmem:[%s1078_s1 + $0xec] ss:$16 sps:$4 sm:$0xff]  }
   0xb   :  { %451 = vmatpush1.bf16.msra.mxu0 %v707_v11  ;;  %504 = vmatpush1.bf16.msra.mxu1 %v708_v12  ;;  %v737_v31 = vld [vmem:[%s1078_s1 + $0xe0] ss:$16 sps:$4 sm:$0xff]   ;;  %v738_v32 = vld [vmem:[%s1078_s1 + $0xe8] ss:$16 sps:$4 sm:$0xff]   ;;  %v739_v33 = vld [vmem:[%s1078_s1 + $0x104] ss:$16 sps:$4 sm:$0xff]  }
   0xc   :  { %452 = vmatprep.subr.bf16.mxu0 %v709_v13  ;;  %505 = vmatprep.subr.bf16.mxu1 %v711_v14  ;;  %v741_v34 = vld [vmem:[%s1078_s1 + $0x10c] ss:$16 sps:$4 sm:$0xff]   ;;  %v743_v35 = vld [vmem:[%s1078_s1 + $0x100] ss:$16 sps:$4 sm:$0xff]   ;;  %v744_v36 = vld [vmem:[%s1078_s1 + $0x108] ss:$16 sps:$4 sm:$0xff]  }
   0xd   :  { %v745_v37 = vld [vmem:[%s1078_s1 + $0x124] ss:$16 sps:$4 sm:$0xff]   ;;  %v747_v38 = vld [vmem:[%s1078_s1 + $0x12c] ss:$16 sps:$4 sm:$0xff]   ;;  %v749_v39 = vld [vmem:[%s1078_s1 + $0x120] ss:$16 sps:$4 sm:$0xff]  }
   0xe   :  { %v750_v40 = vld [vmem:[%s1078_s1 + $0x128] ss:$16 sps:$4 sm:$0xff]   ;;  %v751_v41 = vld [vmem:[%s1078_s1 + $0x144] ss:$16 sps:$4 sm:$0xff]   ;;  %v753_v42 = vld [vmem:[%s1078_s1 + $0x14c] ss:$16 sps:$4 sm:$0xff]  }
   0xf   :  { %453 = vmatpush1.bf16.msra.mxu0 %v713_v15  ;;  %506 = vmatpush1.bf16.msra.mxu1 %v714_v16  ;;  %v755_v43 = vld [vmem:[%s1078_s1 + $0x140] ss:$16 sps:$4 sm:$0xff]   ;;  %v756_v44 = vld [vmem:[%s1078_s1 + $0x148] ss:$16 sps:$4 sm:$0xff]   ;;  %v757_v45 = vld [vmem:[%s1078_s1 + $0x164] ss:$16 sps:$4 sm:$0xff]  }
  0x10   :  { %454 = vmatprep.subr.bf16.mxu0 %v715_v17  ;;  %507 = vmatprep.subr.bf16.mxu1 %v717_v18  ;;  %v759_v46 = vld [vmem:[%s1078_s1 + $0x16c] ss:$16 sps:$4 sm:$0xff]   ;;  %v761_v47 = vld [vmem:[%s1078_s1 + $0x160] ss:$16 sps:$4 sm:$0xff]   ;;  %v762_v49 = vld [vmem:[%s1078_s1 + $0x168] ss:$16 sps:$4 sm:$0xff]  }
  0x11   :  { %v789_v48 = vld [vmem:[%s1079_s0 + $0x4] ss:$8 sps:$4 sm:$0xff]   ;;  %v84_v53 = vld [vmem:[%s1080_s2 + $0x10] sm:$0xff]  ;;  %v768_v55 = vld [vmem:[%s1078_s1 + $0x188] ss:$16 sps:$4 sm:$0xff]  }
  0x12   :  { %v763_v50 = vld [vmem:[%s1078_s1 + $0x184] ss:$16 sps:$4 sm:$0xff]   ;;  %v765_v51 = vld [vmem:[%s1078_s1 + $0x18c] ss:$16 sps:$4 sm:$0xff]   ;;  %478 = vmatprep.mubr.bf16.mxu0 %v789_v48  ;;  %531 = vmatprep.mubr.bf16.mxu1 %v789_v48  ;;  %v767_v54 = vld [vmem:[%s1078_s1 + $0x180] ss:$16 sps:$4 sm:$0xff]  }
  0x13   :  { %455 = vmatpush1.bf16.msra.mxu0 %v719_v19  ;;  %508 = vmatpush1.bf16.msra.mxu1 %v720_v20  ;;  %v82_v52 = vld [vmem:[%s1080_s2] sm:$0xff]  ;;  %v83_v56 = vld [vmem:[%s1080_s2 + $0x8] sm:$0xff]  ;;  %v85_v57 = vld [vmem:[%s1080_s2 + $0x18] sm:$0xff] }
  0x14   :  { %456 = vmatprep.subr.bf16.mxu0 %v721_v21  ;;  %509 = vmatprep.subr.bf16.mxu1 %v723_v22  ;;  %v769_v58 = vld [vmem:[%s1078_s1 + $0x1a4] ss:$16 sps:$4 sm:$0xff]   ;;  %v771_v59 = vld [vmem:[%s1078_s1 + $0x1ac] ss:$16 sps:$4 sm:$0xff]   ;;  %v773_v60 = vld [vmem:[%s1078_s1 + $0x1a0] ss:$16 sps:$4 sm:$0xff]  }
  0x15   :  { %88 = vperm.xlu0 %689, %v82_v52   ;;  %98 = vperm.xlu1 %690, %v84_v53   ;;  %v774_v61 = vld [vmem:[%s1078_s1 + $0x1a8] ss:$16 sps:$4 sm:$0xff]   ;;  %v775_v62 = vld [vmem:[%s1078_s1 + $0x1c4] ss:$16 sps:$4 sm:$0xff]   ;;  %v777_v63 = vld [vmem:[%s1078_s1 + $0x1cc] ss:$16 sps:$4 sm:$0xff]  }
  0x16   :  { %v779_v0 = vld [vmem:[%s1078_s1 + $0x1c0] ss:$16 sps:$4 sm:$0xff]   ;;  %v780_v1 = vld [vmem:[%s1078_s1 + $0x1c8] ss:$16 sps:$4 sm:$0xff]   ;;  %v781_v2 = vld [vmem:[%s1078_s1 + $0x1e4] ss:$16 sps:$4 sm:$0xff]  }
  0x17   :  { %457 = vmatpush1.bf16.msra.mxu0 %v725_v23  ;;  %510 = vmatpush1.bf16.msra.mxu1 %v726_v24  ;;  %v783_v3 = vld [vmem:[%s1078_s1 + $0x1ec] ss:$16 sps:$4 sm:$0xff]   ;;  %v785_v4 = vld [vmem:[%s1078_s1 + $0x1e0] ss:$16 sps:$4 sm:$0xff]   ;;  %v786_v5 = vld [vmem:[%s1078_s1 + $0x1e8] ss:$16 sps:$4 sm:$0xff]  }
  0x18   :  { %458 = vmatprep.subr.bf16.mxu0 %v727_v25  ;;  %511 = vmatprep.subr.bf16.mxu1 %v729_v26  ;;  %v787_v6 = vld [vmem:[%s1079_s0] ss:$8 sps:$4 sm:$0xff]   ;;  %v790_v7 = vld [vmem:[%s1079_s0 + $0x14] ss:$8 sps:$4 sm:$0xff]   ;;  %v792_v8 = vld [vmem:[%s1079_s0 + $0x10] ss:$8 sps:$4 sm:$0xff]  }
  0x19   :  { %93 = vperm.xlu0 %689, %v83_v56   ;;  %103 = vperm.xlu1 %690, %v85_v57  }
  0x1b   :  { %459 = vmatpush1.bf16.msra.mxu0 %v731_v27  ;;  %512 = vmatpush1.bf16.msra.mxu1 %v732_v28 }
  0x1c   :  { %460 = vmatprep.subr.bf16.mxu0 %v733_v29  ;;  %513 = vmatprep.subr.bf16.mxu1 %v735_v30 }
  0x1f   :  { %461 = vmatpush1.bf16.msra.mxu0 %v737_v31  ;;  %514 = vmatpush1.bf16.msra.mxu1 %v738_v32 }
  0x20   :  { %462 = vmatprep.subr.bf16.mxu0 %v739_v33  ;;  %515 = vmatprep.subr.bf16.mxu1 %v741_v34 }
  0x23   :  { %463 = vmatpush1.bf16.msra.mxu0 %v743_v35  ;;  %516 = vmatpush1.bf16.msra.mxu1 %v744_v36 }
  0x24   :  { %464 = vmatprep.subr.bf16.mxu0 %v745_v37  ;;  %517 = vmatprep.subr.bf16.mxu1 %v747_v38 }
  0x27   :  { %465 = vmatpush1.bf16.msra.mxu0 %v749_v39  ;;  %518 = vmatpush1.bf16.msra.mxu1 %v750_v40 }
  0x28   :  { %466 = vmatprep.subr.bf16.mxu0 %v751_v41  ;;  %519 = vmatprep.subr.bf16.mxu1 %v753_v42 }
  0x2b   :  { %467 = vmatpush1.bf16.msra.mxu0 %v755_v43  ;;  %520 = vmatpush1.bf16.msra.mxu1 %v756_v44 }
  0x2c   :  { %468 = vmatprep.subr.bf16.mxu0 %v757_v45  ;;  %521 = vmatprep.subr.bf16.mxu1 %v759_v46 }
  0x2f   :  { %469 = vmatpush1.bf16.msra.mxu0 %v761_v47  ;;  %522 = vmatpush1.bf16.msra.mxu1 %v762_v49 }
  0x30   :  { %470 = vmatprep.subr.bf16.mxu0 %v763_v50  ;;  %523 = vmatprep.subr.bf16.mxu1 %v765_v51 }
  0x33   :  { %471 = vmatpush1.bf16.msra.mxu0 %v767_v54  ;;  %524 = vmatpush1.bf16.msra.mxu1 %v768_v55 }
  0x34   :  { %472 = vmatprep.subr.bf16.mxu0 %v769_v58  ;;  %525 = vmatprep.subr.bf16.mxu1 %v771_v59 }
  0x37   :  { %473 = vmatpush1.bf16.msra.mxu0 %v773_v60  ;;  %526 = vmatpush1.bf16.msra.mxu1 %v774_v61 }
  0x38   :  { %474 = vmatprep.subr.bf16.mxu0 %v775_v62  ;;  %527 = vmatprep.subr.bf16.mxu1 %v777_v63 }
  0x3b   :  { %475 = vmatpush1.bf16.msra.mxu0 %v779_v0  ;;  %528 = vmatpush1.bf16.msra.mxu1 %v780_v1 }
  0x3c   :  { %476 = vmatprep.subr.bf16.mxu0 %v781_v2  ;;  %529 = vmatprep.subr.bf16.mxu1 %v783_v3 }
  0x3f   :  { %477 = vmatpush1.bf16.msra.mxu0 %v785_v4  ;;  %530 = vmatpush1.bf16.msra.mxu1 %v786_v5 }
  0x42   :  { %479 = vmatmul.mubr.bf16.vlgmr.msra.gmra.mrb[0].mxu0 %v787_v6  ;;  %532 = vmatmul.mubr.bf16.vlgmr.msra.gmra.mrb[0].mxu1 %v787_v6 }
  0x43   :  { %488 = vmatprep.mubr.bf16.mxu0 %v790_v7  ;;  %541 = vmatprep.mubr.bf16.mxu1 %v790_v7 }
  0x4a   :  { %489 = vmatmul.mubr.bf16.gmra.mrb[4].mxu0 %v792_v8  ;;  %542 = vmatmul.mubr.bf16.gmra.mrb[4].mxu1 %v792_v8 }
  0x94   :  { %v89_v9 = vpop.permute.xlu0 %88  ;;  %v99_v37 = vpop.permute.xlu1 %98 }
  0x98   :  { %v94_v10 = vpop.permute.xlu0 %93  ;;  %v104_v56 = vpop.permute.xlu1 %103 }
 0x115   :  { %v480_v11 = vpop.f32.mrb[0].mxu0  ;;  %v533_v12 = vpop.f32.mrb[0].mxu1 }
 0x116   :  { %v481_v13 = vadd.f32 %v480_v11, %v89_v9  ;;  %v534_v14 = vadd.f32 %v533_v12, %v89_v9  ;;  %v482_v15 = vpop.f32.mrb[1].mxu0  ;;  %v535_v16 = vpop.f32.mrb[1].mxu1 }
 0x117   :  { %v483_v17 = vadd.f32 %v482_v15, %v89_v9  ;;  %v536_v18 = vadd.f32 %v535_v16, %v89_v9  ;;  %v484_v19 = vpop.f32.mrb[2].mxu0  ;;  %v537_v20 = vpop.f32.mrb[2].mxu1 }
 0x118   :  { %vm552_vm0 = vcmp.gt.f32.partialorder %v481_v13, 0.0  ;;  %v568_v21 = vmul.f32 0.2, %v481_v13  ;;  %vm554_vm1 = vcmp.gt.f32.partialorder %v534_v14, 0.0  ;;  %v570_v22 = vmul.f32 0.2, %v534_v14 }
 0x119   :  { %vm553_vm2 = vcmp.gt.f32.partialorder %v483_v17, 0.0  ;;  %v569_v23 = vmul.f32 0.2, %v483_v17  ;;  %vm555_vm3 = vcmp.gt.f32.partialorder %v536_v18, 0.0  ;;  %v571_v24 = vmul.f32 0.2, %v536_v18 }
 0x11a   :  { %v584_v25 = vsel %vm552_vm0, %v481_v13, %v568_v21  ;;  %v586_v26 = vsel %vm554_vm1, %v534_v14, %v570_v22  ;;  %v485_v27 = vadd.f32 %v484_v19, %v94_v10  ;;  %v538_v28 = vadd.f32 %v537_v20, %v94_v10  ;;  %v486_v29 = vpop.f32.mrb[3].mxu0  ;;  %v539_v30 = vpop.f32.mrb[3].mxu1 }
 0x11b   :  { %600 = vst [vmem:[%s1081_s3] sm:$0xff] %v584_v25  ;;  %602 = vst [vmem:[%s1081_s3 + $0x10] sm:$0xff] %v586_v26  ;;  %v585_v31 = vsel %vm553_vm2, %v483_v17, %v569_v23  ;;  %v587_v32 = vsel %vm555_vm3, %v536_v18, %v571_v24  ;;  %v487_v33 = vadd.f32 %v486_v29, %v94_v10 }
 0x11c   :  { %v540_v34 = vadd.f32 %v539_v30, %v94_v10  ;;  %601 = vst [vmem:[%s1081_s3 + $0x8] sm:$0xff] %v585_v31  ;;  %603 = vst [vmem:[%s1081_s3 + $0x18] sm:$0xff] %v587_v32  ;;  %vm556_vm4 = vcmp.gt.f32.partialorder %v485_v27, 0.0  ;;  %v572_v35 = vmul.f32 0.2, %v485_v27  ;;  %vm558_vm5 = vcmp.gt.f32.partialorder %v538_v28, 0.0 }
 0x11d   :  { %v574_v36 = vmul.f32 0.2, %v538_v28  ;;  %vm557_vm6 = vcmp.gt.f32.partialorder %v487_v33, 0.0  ;;  %v573_v38 = vmul.f32 0.2, %v487_v33  ;;  %v490_v42 = vpop.f32.mrb[4].mxu0 }
 0x11e   :  { %vm559_vm7 = vcmp.gt.f32.partialorder %v540_v34, 0.0  ;;  %v575_v39 = vmul.f32 0.2, %v540_v34  ;;  %v588_v40 = vsel %vm556_vm4, %v485_v27, %v572_v35  ;;  %v543_v43 = vpop.f32.mrb[4].mxu1  ;;  %v491_v46 = vadd.f32 %v490_v42, %v99_v37  ;;  %v492_v48 = vpop.f32.mrb[5].mxu0 }
 0x11f   :  { %v590_v41 = vsel %vm558_vm5, %v538_v28, %v574_v36  ;;  %604 = vst [vmem:[%s1081_s3 + $0x20] sm:$0xff] %v588_v40  ;;  %v589_v44 = vsel %vm557_vm6, %v487_v33, %v573_v38  ;;  %v544_v47 = vadd.f32 %v543_v43, %v99_v37  ;;  %v545_v49 = vpop.f32.mrb[5].mxu1  ;;  %v493_v50 = vadd.f32 %v492_v48, %v99_v37  ;;  %v494_v52 = vpop.f32.mrb[6].mxu0 }
 0x120   :  { %606 = vst [vmem:[%s1081_s3 + $0x30] sm:$0xff] %v590_v41  ;;  %v591_v45 = vsel %vm559_vm7, %v540_v34, %v575_v39  ;;  %605 = vst [vmem:[%s1081_s3 + $0x28] sm:$0xff] %v589_v44  ;;  %v546_v51 = vadd.f32 %v545_v49, %v99_v37  ;;  %v547_v53 = vpop.f32.mrb[6].mxu1  ;;  %vm560_vm8 = vcmp.gt.f32.partialorder %v491_v46, 0.0  ;;  %v576_v54 = vmul.f32 0.2, %v491_v46 }
 0x121   :  { %607 = vst [vmem:[%s1081_s3 + $0x38] sm:$0xff] %v591_v45  ;;  %vm562_vm9 = vcmp.gt.f32.partialorder %v544_v47, 0.0  ;;  %v578_v55 = vmul.f32 0.2, %v544_v47  ;;  %vm561_vm10 = vcmp.gt.f32.partialorder %v493_v50, 0.0  ;;  %v495_v61 = vadd.f32 %v494_v52, %v104_v56  ;;  %v496_v63 = vpop.f32.mrb[7].mxu0 }
 0x122   :  { %v577_v57 = vmul.f32 0.2, %v493_v50  ;;  %vm563_vm11 = vcmp.gt.f32.partialorder %v546_v51, 0.0  ;;  %v579_v58 = vmul.f32 0.2, %v546_v51  ;;  %v592_v59 = vsel %vm560_vm8, %v491_v46, %v576_v54  ;;  %v549_v0 = vpop.f32.mrb[7].mxu1 }
 0x123   :  { %v594_v60 = vsel %vm562_vm9, %v544_v47, %v578_v55  ;;  %v548_v62 = vadd.f32 %v547_v53, %v104_v56  ;;  %608 = vst [vmem:[%s1081_s3 + $0x40] sm:$0xff] %v592_v59  ;;  %v497_v3 = vadd.f32 %v496_v63, %v104_v56  ;;  %v550_v4 = vadd.f32 %v549_v0, %v104_v56 }
 0x124   :  { %610 = vst [vmem:[%s1081_s3 + $0x50] sm:$0xff] %v594_v60  ;;  %v593_v1 = vsel %vm561_vm10, %v493_v50, %v577_v57  ;;  %v595_v2 = vsel %vm563_vm11, %v546_v51, %v579_v58  ;;  %vm564_vm12 = vcmp.gt.f32.partialorder %v495_v61, 0.0  ;;  %v580_v5 = vmul.f32 0.2, %v495_v61 }
 0x125   :  { %609 = vst [vmem:[%s1081_s3 + $0x48] sm:$0xff] %v593_v1  ;;  %611 = vst [vmem:[%s1081_s3 + $0x58] sm:$0xff] %v595_v2  ;;  %vm566_vm13 = vcmp.gt.f32.partialorder %v548_v62, 0.0  ;;  %v582_v6 = vmul.f32 0.2, %v548_v62  ;;  %vm565_vm14 = vcmp.gt.f32.partialorder %v497_v3, 0.0 }
 0x126   :  { %v581_v7 = vmul.f32 0.2, %v497_v3  ;;  %vm567_vm15 = vcmp.gt.f32.partialorder %v550_v4, 0.0  ;;  %v583_v8 = vmul.f32 0.2, %v550_v4  ;;  %v596_v9 = vsel %vm564_vm12, %v495_v61, %v580_v5 }
 0x127   :  { %v598_v10 = vsel %vm566_vm13, %v548_v62, %v582_v6  ;;  %612 = vst [vmem:[%s1081_s3 + $0x60] sm:$0xff] %v596_v9 }
 0x128   :  { %614 = vst [vmem:[%s1081_s3 + $0x70] sm:$0xff] %v598_v10  ;;  %v597_v11 = vsel %vm565_vm14, %v497_v3, %v581_v7  ;;  %v599_v12 = vsel %vm567_vm15, %v550_v4, %v583_v8 }
 0x129   :  { %613 = vst [vmem:[%s1081_s3 + $0x68] sm:$0xff] %v597_v11  ;;  %615 = vst [vmem:[%s1081_s3 + $0x78] sm:$0xff] %v599_v12 }

// kernel: custom-call.2
= control target key start
LH: loop header
LB: loop body
LE: loop exit
PB: predicated region body
PF: predicated region fallthrough
CT: control target
= control target key end

     0   :  { %s6_s0 = inlined_call_operand.vmem [shape: f32[512], index: 0, kind: output, shape index: {}]  }

// kernel: single_disc_forward.7
= control target key start
LH: loop header
LB: loop body
LE: loop exit
PB: predicated region body
PF: predicated region fallthrough
CT: control target
= control target key end

     0   :  { %v768_v1 = vmov 0   ;;  %s981_s1 = inlined_call_operand.vmem [shape: bf16[512,128], index: 1, kind: input, shape index: {}]   ;;  %s982_s0 = inlined_call_operand.vmem [shape: bf16[64,512], index: 0, kind: input, shape index: {}]   ;;  %s983_s2 = inlined_call_operand.vmem [shape: f32[64,1], index: 2, kind: input, shape index: {}]   ;;  %s984_s3 = inlined_call_operand.vmem [shape: f32[64,128], index: 3, kind: output, shape index: {}]  }
   0x1   :  { %v712_v0 = vld [vmem:[%s981_s1 + $0x40] sm:$0xff]   ;;  %710 = vset.pattern.permute.xlu0 %v768_v1  ;;  %711 = vset.pattern.permute.xlu1 %v768_v1  ;;  %v716_v5 = vld [vmem:[%s981_s1 + $0x48] sm:$0xff]   ;;  %v720_v9 = vld [vmem:[%s981_s1 + $0x50] sm:$0xff]  }
   0x2   :  { %v713_v2 = vld [vmem:[%s981_s1 + $0xc0] sm:$0xff]   ;;  %629 = vmatprep.subr.bf16.mxu0 %v712_v0  ;;  %v717_v6 = vld [vmem:[%s981_s1 + $0xc8] sm:$0xff]   ;;  %v721_v10 = vld [vmem:[%s981_s1 + $0xd0] sm:$0xff]  }
   0x3   :  { %v714_v3 = vld [vmem:[%s981_s1] sm:$0xff]   ;;  %669 = vmatprep.subr.bf16.mxu1 %v713_v2  ;;  %v718_v7 = vld [vmem:[%s981_s1 + $0x8] sm:$0xff]   ;;  %v722_v11 = vld [vmem:[%s981_s1 + $0x10] sm:$0xff]  }
   0x4   :  { %v715_v4 = vld [vmem:[%s981_s1 + $0x80] sm:$0xff]   ;;  %630 = vmatpush3.bf16.msra.mxu0 %v714_v3  ;;  %v719_v8 = vld [vmem:[%s981_s1 + $0x88] sm:$0xff]   ;;  %v723_v12 = vld [vmem:[%s981_s1 + $0x90] sm:$0xff]  }
   0x5   :  { %670 = vmatpush3.bf16.msra.mxu1 %v715_v4  ;;  %631 = vmatprep.subr.bf16.mxu0 %v716_v5  ;;  %v724_v13 = vld [vmem:[%s981_s1 + $0x58] sm:$0xff]   ;;  %v728_v17 = vld [vmem:[%s981_s1 + $0x60] sm:$0xff]   ;;  %v732_v21 = vld [vmem:[%s981_s1 + $0x68] sm:$0xff]  }
   0x6   :  { %671 = vmatprep.subr.bf16.mxu1 %v717_v6  ;;  %v725_v14 = vld [vmem:[%s981_s1 + $0xd8] sm:$0xff]   ;;  %v729_v18 = vld [vmem:[%s981_s1 + $0xe0] sm:$0xff]   ;;  %v733_v22 = vld [vmem:[%s981_s1 + $0xe8] sm:$0xff]  }
   0x7   :  { %v726_v15 = vld [vmem:[%s981_s1 + $0x18] sm:$0xff]   ;;  %v730_v19 = vld [vmem:[%s981_s1 + $0x20] sm:$0xff]   ;;  %v734_v23 = vld [vmem:[%s981_s1 + $0x28] sm:$0xff]  }
   0x8   :  { %632 = vmatpush3.bf16.msra.mxu0 %v718_v7  ;;  %v727_v16 = vld [vmem:[%s981_s1 + $0x98] sm:$0xff]   ;;  %v731_v20 = vld [vmem:[%s981_s1 + $0xa0] sm:$0xff]   ;;  %v735_v24 = vld [vmem:[%s981_s1 + $0xa8] sm:$0xff]  }
   0x9   :  { %672 = vmatpush3.bf16.msra.mxu1 %v719_v8  ;;  %633 = vmatprep.subr.bf16.mxu0 %v720_v9  ;;  %v736_v25 = vld [vmem:[%s981_s1 + $0x70] sm:$0xff]   ;;  %v740_v29 = vld [vmem:[%s981_s1 + $0x78] sm:$0xff]   ;;  %v95_v43 = vld [vmem:[%s983_s2] sm:$0xff] }
   0xa   :  { %673 = vmatprep.subr.bf16.mxu1 %v721_v10  ;;  %v737_v26 = vld [vmem:[%s981_s1 + $0xf0] sm:$0xff]   ;;  %v741_v30 = vld [vmem:[%s981_s1 + $0xf8] sm:$0xff]   ;;  %105 = vperm.xlu0 %710, %v95_v43   ;;  %v96_v45 = vld [vmem:[%s983_s2 + $0x8] sm:$0xff] }
   0xb   :  { %v738_v27 = vld [vmem:[%s981_s1 + $0x30] sm:$0xff]   ;;  %v742_v31 = vld [vmem:[%s981_s1 + $0x38] sm:$0xff]   ;;  %v99_v48 = vld [vmem:[%s983_s2 + $0x20] sm:$0xff] }
   0xc   :  { %634 = vmatpush3.bf16.msra.mxu0 %v722_v11  ;;  %v739_v28 = vld [vmem:[%s981_s1 + $0xb0] sm:$0xff]   ;;  %v743_v32 = vld [vmem:[%s981_s1 + $0xb8] sm:$0xff]   ;;  %v100_v51 = vld [vmem:[%s983_s2 + $0x28] sm:$0xff] }
   0xd   :  { %674 = vmatpush3.bf16.msra.mxu1 %v723_v12  ;;  %635 = vmatprep.subr.bf16.mxu0 %v724_v13  ;;  %v744_v33 = vld [vmem:[%s982_s0] ss:$16 sps:$4 sm:$0xff]   ;;  %v746_v34 = vld [vmem:[%s982_s0 + $0x4] ss:$16 sps:$4 sm:$0xff]   ;;  %v747_v35 = vld [vmem:[%s982_s0 + $0x8] ss:$16 sps:$4 sm:$0xff]  }
   0xe   :  { %675 = vmatprep.subr.bf16.mxu1 %v725_v14  ;;  %v749_v36 = vld [vmem:[%s982_s0 + $0xc] ss:$16 sps:$4 sm:$0xff]   ;;  %447 = vmatprep.mubr.bf16.mxu0 %v746_v34  ;;  %v750_v37 = vld [vmem:[%s982_s0 + $0x24] ss:$16 sps:$4 sm:$0xff]   ;;  %v754_v39 = vld [vmem:[%s982_s0 + $0x20] ss:$16 sps:$4 sm:$0xff]  }
   0xf   :  { %512 = vmatprep.mubr.bf16.mxu1 %v749_v36  ;;  %v752_v38 = vld [vmem:[%s982_s0 + $0x2c] ss:$16 sps:$4 sm:$0xff]   ;;  %v755_v40 = vld [vmem:[%s982_s0 + $0x28] ss:$16 sps:$4 sm:$0xff]   ;;  %v756_v41 = vld [vmem:[%s982_s0 + $0x44] ss:$16 sps:$4 sm:$0xff]   ;;  %110 = vperm.xlu0 %710, %v96_v45  }
  0x10   :  { %636 = vmatpush3.bf16.msra.mxu0 %v726_v15  ;;  %v758_v42 = vld [vmem:[%s982_s0 + $0x4c] ss:$16 sps:$4 sm:$0xff]   ;;  %v97_v44 = vld [vmem:[%s983_s2 + $0x10] sm:$0xff]  ;;  %v761_v49 = vld [vmem:[%s982_s0 + $0x48] ss:$16 sps:$4 sm:$0xff]  }
  0x11   :  { %676 = vmatpush3.bf16.msra.mxu1 %v727_v16  ;;  %637 = vmatprep.subr.bf16.mxu0 %v728_v17  ;;  %v98_v46 = vld [vmem:[%s983_s2 + $0x18] sm:$0xff]  ;;  %v760_v47 = vld [vmem:[%s982_s0 + $0x40] ss:$16 sps:$4 sm:$0xff]   ;;  %v762_v50 = vld [vmem:[%s982_s0 + $0x64] ss:$16 sps:$4 sm:$0xff]  }
  0x12   :  { %677 = vmatprep.subr.bf16.mxu1 %v729_v18  ;;  %115 = vperm.xlu1 %711, %v97_v44   ;;  %v764_v52 = vld [vmem:[%s982_s0 + $0x6c] ss:$16 sps:$4 sm:$0xff]   ;;  %v101_v53 = vld [vmem:[%s983_s2 + $0x30] sm:$0xff]  ;;  %v767_v56 = vld [vmem:[%s982_s0 + $0x68] ss:$16 sps:$4 sm:$0xff]  }
  0x13   :  { %125 = vperm.xlu0 %710, %v99_v48   ;;  %v102_v54 = vld [vmem:[%s983_s2 + $0x38] sm:$0xff]  ;;  %v766_v55 = vld [vmem:[%s982_s0 + $0x60] ss:$16 sps:$4 sm:$0xff]  }
  0x14   :  { %638 = vmatpush3.bf16.msra.mxu0 %v730_v19 }
  0x15   :  { %678 = vmatpush3.bf16.msra.mxu1 %v731_v20  ;;  %639 = vmatprep.subr.bf16.mxu0 %v732_v21 }
  0x16   :  { %679 = vmatprep.subr.bf16.mxu1 %v733_v22  ;;  %120 = vperm.xlu1 %711, %v98_v46  }
  0x17   :  { %135 = vperm.xlu0 %710, %v101_v53  }
  0x18   :  { %640 = vmatpush3.bf16.msra.mxu0 %v734_v23 }
  0x19   :  { %680 = vmatpush3.bf16.msra.mxu1 %v735_v24  ;;  %641 = vmatprep.subr.bf16.mxu0 %v736_v25 }
  0x1a   :  { %681 = vmatprep.subr.bf16.mxu1 %v737_v26  ;;  %130 = vperm.xlu1 %711, %v100_v51  }
  0x1c   :  { %642 = vmatpush3.bf16.msra.mxu0 %v738_v27 }
  0x1d   :  { %682 = vmatpush3.bf16.msra.mxu1 %v739_v28  ;;  %643 = vmatprep.subr.bf16.mxu0 %v740_v29 }
  0x1e   :  { %683 = vmatprep.subr.bf16.mxu1 %v741_v30  ;;  %140 = vperm.xlu1 %711, %v102_v54  }
  0x20   :  { %644 = vmatpush3.bf16.msra.mxu0 %v742_v31 }
  0x21   :  { %684 = vmatpush3.bf16.msra.mxu1 %v743_v32 }
  0x23   :  { %448 = vmatmul.mubr.bf16.vlgmr.msra.gmra.mrb[0].mxu0 %v744_v33 }
  0x24   :  { %513 = vmatmul.mubr.bf16.vlgmr.msra.gmra.mrb[0].mxu1 %v747_v35  ;;  %455 = vmatprep.mubr.bf16.mxu0 %v750_v37 }
  0x25   :  { %520 = vmatprep.mubr.bf16.mxu1 %v752_v38 }
  0x2b   :  { %456 = vmatmul.mubr.bf16.gmra.mrb[4].mxu0 %v754_v39 }
  0x2c   :  { %521 = vmatmul.mubr.bf16.gmra.mrb[4].mxu1 %v755_v40  ;;  %463 = vmatprep.mubr.bf16.mxu0 %v756_v41 }
  0x2d   :  { %528 = vmatprep.mubr.bf16.mxu1 %v758_v42 }
  0x33   :  { %464 = vmatmul.mubr.bf16.gmra.mrb[8].mxu0 %v760_v47 }
  0x34   :  { %529 = vmatmul.mubr.bf16.gmra.mrb[8].mxu1 %v761_v49  ;;  %471 = vmatprep.mubr.bf16.mxu0 %v762_v50 }
  0x35   :  { %536 = vmatprep.mubr.bf16.mxu1 %v764_v52 }
  0x3b   :  { %472 = vmatmul.mubr.bf16.gmra.mrb[12].mxu0 %v766_v55 }
  0x3c   :  { %537 = vmatmul.mubr.bf16.gmra.mrb[12].mxu1 %v767_v56 }
  0x89   :  { %v106_v57 = vpop.permute.xlu0 %105 }
  0x8e   :  { %v111_v59 = vpop.permute.xlu0 %110 }
  0x91   :  { %v116_v10 = vpop.permute.xlu1 %115 }
  0x92   :  { %v126_v34 = vpop.permute.xlu0 %125 }
  0x95   :  { %v121_v28 = vpop.permute.xlu1 %120 }
  0x96   :  { %v136_v54 = vpop.permute.xlu0 %135 }
  0x99   :  { %v131_v50 = vpop.permute.xlu1 %130 }
  0xf6   :  { %v645_v58 = vpop.f32.mrb[0].mxu0 }
  0xf7   :  { %v685_v60 = vpop.f32.mrb[0].mxu1  ;;  %v646_v61 = vpop.f32.mrb[1].mxu0 }
  0xf8   :  { %v647_v62 = vadd.f32 %v646_v61, %v645_v58  ;;  %v686_v63 = vpop.f32.mrb[1].mxu1  ;;  %v648_v0 = vpop.f32.mrb[2].mxu0 }
  0xf9   :  { %v687_v1 = vadd.f32 %v686_v63, %v685_v60  ;;  %v688_v2 = vpop.f32.mrb[2].mxu1  ;;  %v649_v3 = vpop.f32.mrb[3].mxu0 }
  0xfa   :  { %v450_v4 = vadd.f32 %v647_v62, %v106_v57  ;;  %v650_v5 = vadd.f32 %v649_v3, %v648_v0  ;;  %v689_v6 = vpop.f32.mrb[3].mxu1 }
  0xfb   :  { %v690_v7 = vadd.f32 %v689_v6, %v688_v2 }
  0xfc   :  { %v515_v8 = vadd.f32 %v687_v1, %v450_v4  ;;  %v453_v9 = vadd.f32 %v650_v5, %v111_v59 }
  0xfe   :  { %vm545_vm0 = vcmp.gt.f32.partialorder %v515_v8, 0.0  ;;  %v553_v11 = vmul.f32 0.2, %v515_v8  ;;  %v518_v12 = vadd.f32 %v690_v7, %v453_v9  ;;  %v651_v13 = vpop.f32.mrb[4].mxu0 }
  0xff   :  { %v691_v14 = vpop.f32.mrb[4].mxu1  ;;  %v652_v15 = vpop.f32.mrb[5].mxu0 }
 0x100   :  { %v561_v16 = vsel %vm545_vm0, %v515_v8, %v553_v11  ;;  %vm546_vm1 = vcmp.gt.f32.partialorder %v518_v12, 0.0  ;;  %v554_v17 = vmul.f32 0.2, %v518_v12  ;;  %v653_v18 = vadd.f32 %v652_v15, %v651_v13  ;;  %v692_v19 = vpop.f32.mrb[5].mxu1  ;;  %v654_v20 = vpop.f32.mrb[6].mxu0 }
 0x101   :  { %569 = vst [vmem:[%s984_s3] sm:$0xff] %v561_v16  ;;  %v693_v21 = vadd.f32 %v692_v19, %v691_v14  ;;  %v694_v22 = vpop.f32.mrb[6].mxu1  ;;  %v655_v23 = vpop.f32.mrb[7].mxu0 }
 0x102   :  { %v562_v24 = vsel %vm546_vm1, %v518_v12, %v554_v17  ;;  %v458_v25 = vadd.f32 %v653_v18, %v116_v10  ;;  %v656_v26 = vadd.f32 %v655_v23, %v654_v20  ;;  %v695_v27 = vpop.f32.mrb[7].mxu1  ;;  %v141_v8 = vpop.permute.xlu1 %140 }
 0x103   :  { %570 = vst [vmem:[%s984_s3 + $0x8] sm:$0xff] %v562_v24  ;;  %v696_v29 = vadd.f32 %v695_v27, %v694_v22 }
 0x104   :  { %v523_v30 = vadd.f32 %v693_v21, %v458_v25  ;;  %v461_v31 = vadd.f32 %v656_v26, %v121_v28 }
 0x106   :  { %vm547_vm2 = vcmp.gt.f32.partialorder %v523_v30, 0.0  ;;  %v555_v32 = vmul.f32 0.2, %v523_v30  ;;  %v526_v33 = vadd.f32 %v696_v29, %v461_v31  ;;  %v657_v35 = vpop.f32.mrb[8].mxu0 }
 0x107   :  { %v697_v36 = vpop.f32.mrb[8].mxu1  ;;  %v658_v37 = vpop.f32.mrb[9].mxu0 }
 0x108   :  { %v563_v38 = vsel %vm547_vm2, %v523_v30, %v555_v32  ;;  %vm548_vm3 = vcmp.gt.f32.partialorder %v526_v33, 0.0  ;;  %v556_v39 = vmul.f32 0.2, %v526_v33  ;;  %v659_v40 = vadd.f32 %v658_v37, %v657_v35  ;;  %v698_v41 = vpop.f32.mrb[9].mxu1  ;;  %v660_v42 = vpop.f32.mrb[10].mxu0 }
 0x109   :  { %571 = vst [vmem:[%s984_s3 + $0x10] sm:$0xff] %v563_v38  ;;  %v699_v43 = vadd.f32 %v698_v41, %v697_v36  ;;  %v700_v44 = vpop.f32.mrb[10].mxu1  ;;  %v661_v45 = vpop.f32.mrb[11].mxu0 }
 0x10a   :  { %v564_v46 = vsel %vm548_vm3, %v526_v33, %v556_v39  ;;  %v466_v47 = vadd.f32 %v659_v40, %v126_v34  ;;  %v662_v48 = vadd.f32 %v661_v45, %v660_v42  ;;  %v701_v49 = vpop.f32.mrb[11].mxu1 }
 0x10b   :  { %572 = vst [vmem:[%s984_s3 + $0x18] sm:$0xff] %v564_v46  ;;  %v702_v51 = vadd.f32 %v701_v49, %v700_v44 }
 0x10c   :  { %v531_v52 = vadd.f32 %v699_v43, %v466_v47  ;;  %v469_v53 = vadd.f32 %v662_v48, %v131_v50 }
 0x10e   :  { %vm549_vm4 = vcmp.gt.f32.partialorder %v531_v52, 0.0  ;;  %v557_v55 = vmul.f32 0.2, %v531_v52  ;;  %v534_v56 = vadd.f32 %v702_v51, %v469_v53  ;;  %v663_v57 = vpop.f32.mrb[12].mxu0 }
 0x10f   :  { %v703_v58 = vpop.f32.mrb[12].mxu1  ;;  %v664_v59 = vpop.f32.mrb[13].mxu0 }
 0x110   :  { %v565_v60 = vsel %vm549_vm4, %v531_v52, %v557_v55  ;;  %vm550_vm5 = vcmp.gt.f32.partialorder %v534_v56, 0.0  ;;  %v558_v61 = vmul.f32 0.2, %v534_v56  ;;  %v665_v62 = vadd.f32 %v664_v59, %v663_v57  ;;  %v704_v63 = vpop.f32.mrb[13].mxu1  ;;  %v666_v0 = vpop.f32.mrb[14].mxu0 }
 0x111   :  { %573 = vst [vmem:[%s984_s3 + $0x20] sm:$0xff] %v565_v60  ;;  %v705_v1 = vadd.f32 %v704_v63, %v703_v58  ;;  %v706_v2 = vpop.f32.mrb[14].mxu1  ;;  %v667_v3 = vpop.f32.mrb[15].mxu0 }
 0x112   :  { %v566_v4 = vsel %vm550_vm5, %v534_v56, %v558_v61  ;;  %v474_v5 = vadd.f32 %v665_v62, %v136_v54  ;;  %v668_v6 = vadd.f32 %v667_v3, %v666_v0  ;;  %v707_v7 = vpop.f32.mrb[15].mxu1 }
 0x113   :  { %574 = vst [vmem:[%s984_s3 + $0x28] sm:$0xff] %v566_v4  ;;  %v708_v9 = vadd.f32 %v707_v7, %v706_v2 }
 0x114   :  { %v539_v10 = vadd.f32 %v705_v1, %v474_v5  ;;  %v477_v11 = vadd.f32 %v668_v6, %v141_v8 }
 0x116   :  { %vm551_vm6 = vcmp.gt.f32.partialorder %v539_v10, 0.0  ;;  %v559_v12 = vmul.f32 0.2, %v539_v10  ;;  %v542_v13 = vadd.f32 %v708_v9, %v477_v11 }
 0x118   :  { %v567_v14 = vsel %vm551_vm6, %v539_v10, %v559_v12  ;;  %vm552_vm7 = vcmp.gt.f32.partialorder %v542_v13, 0.0  ;;  %v560_v15 = vmul.f32 0.2, %v542_v13 }
 0x119   :  { %575 = vst [vmem:[%s984_s3 + $0x30] sm:$0xff] %v567_v14 }
 0x11a   :  { %v568_v16 = vsel %vm552_vm7, %v542_v13, %v560_v15 }
 0x11b   :  { %576 = vst [vmem:[%s984_s3 + $0x38] sm:$0xff] %v568_v16 }

// kernel: custom-call.3
= control target key start
LH: loop header
LB: loop body
LE: loop exit
PB: predicated region body
PF: predicated region fallthrough
CT: control target
= control target key end

     0   :  { %s6_s0 = inlined_call_operand.vmem [shape: f32[1024], index: 0, kind: output, shape index: {}]  }

// kernel: single_disc_forward.8
= control target key start
LH: loop header
LB: loop body
LE: loop exit
PB: predicated region body
PF: predicated region fallthrough
CT: control target
= control target key end

     0   :  { %v1387_v1 = vmov 0   ;;  %vm1051_vm1 = vcmask 408576   ;;  %s1776_s1 = inlined_call_operand.vmem [shape: bf16[1024,50], index: 1, kind: input, shape index: {}]   ;;  %s1777_s0 = inlined_call_operand.vmem [shape: bf16[64,1024], index: 0, kind: input, shape index: {}]   ;;  %s1778_s2 = inlined_call_operand.vmem [shape: f32[64,1], index: 2, kind: input, shape index: {}]   ;;  %s1779_s3 = inlined_call_operand.vmem [shape: f32[64,50], index: 3, kind: output, shape index: {}]  }
   0x1   :  { %v1323_v0 = vld [vmem:[%s1776_s1 + $0x40] sm:$0xff]   ;;  %1321 = vset.pattern.permute.xlu0 %v1387_v1  ;;  %1322 = vset.pattern.permute.xlu1 %v1387_v1  ;;  %v1327_v5 = vld [vmem:[%s1776_s1 + $0x48] sm:$0xff]   ;;  %v1331_v9 = vld [vmem:[%s1776_s1 + $0x50] sm:$0xff]  }
   0x2   :  { %v1324_v2 = vld [vmem:[%s1776_s1 + $0xc0] sm:$0xff]   ;;  %1160 = vmatprep.subr.bf16.mxu0 %v1323_v0  ;;  %v1328_v6 = vld [vmem:[%s1776_s1 + $0xc8] sm:$0xff]   ;;  %v1332_v10 = vld [vmem:[%s1776_s1 + $0xd0] sm:$0xff]  }
   0x3   :  { %v1325_v3 = vld [vmem:[%s1776_s1] sm:$0xff]   ;;  %1200 = vmatprep.subr.bf16.mxu1 %v1324_v2  ;;  %v1329_v7 = vld [vmem:[%s1776_s1 + $0x8] sm:$0xff]   ;;  %v1333_v11 = vld [vmem:[%s1776_s1 + $0x10] sm:$0xff]  }
   0x4   :  { %v1326_v4 = vld [vmem:[%s1776_s1 + $0x80] sm:$0xff]   ;;  %1161 = vmatpush3.bf16.msra.mxu0 %v1325_v3  ;;  %v1330_v8 = vld [vmem:[%s1776_s1 + $0x88] sm:$0xff]   ;;  %v1334_v12 = vld [vmem:[%s1776_s1 + $0x90] sm:$0xff]  }
   0x5   :  { %1201 = vmatpush3.bf16.msra.mxu1 %v1326_v4  ;;  %1162 = vmatprep.subr.bf16.mxu0 %v1327_v5  ;;  %v1335_v13 = vld [vmem:[%s1776_s1 + $0x58] sm:$0xff]   ;;  %v1339_v17 = vld [vmem:[%s1776_s1 + $0x60] sm:$0xff]   ;;  %v1343_v21 = vld [vmem:[%s1776_s1 + $0x68] sm:$0xff]  }
   0x6   :  { %1202 = vmatprep.subr.bf16.mxu1 %v1328_v6  ;;  %v1336_v14 = vld [vmem:[%s1776_s1 + $0xd8] sm:$0xff]   ;;  %v1340_v18 = vld [vmem:[%s1776_s1 + $0xe0] sm:$0xff]   ;;  %v1344_v22 = vld [vmem:[%s1776_s1 + $0xe8] sm:$0xff]  }
   0x7   :  { %v1337_v15 = vld [vmem:[%s1776_s1 + $0x18] sm:$0xff]   ;;  %v1341_v19 = vld [vmem:[%s1776_s1 + $0x20] sm:$0xff]   ;;  %v1345_v23 = vld [vmem:[%s1776_s1 + $0x28] sm:$0xff]  }
   0x8   :  { %1163 = vmatpush3.bf16.msra.mxu0 %v1329_v7  ;;  %v1338_v16 = vld [vmem:[%s1776_s1 + $0x98] sm:$0xff]   ;;  %v1342_v20 = vld [vmem:[%s1776_s1 + $0xa0] sm:$0xff]   ;;  %v1346_v24 = vld [vmem:[%s1776_s1 + $0xa8] sm:$0xff]  }
   0x9   :  { %1203 = vmatpush3.bf16.msra.mxu1 %v1330_v8  ;;  %1164 = vmatprep.subr.bf16.mxu0 %v1331_v9  ;;  %v1347_v25 = vld [vmem:[%s1776_s1 + $0x70] sm:$0xff]   ;;  %v1351_v29 = vld [vmem:[%s1776_s1 + $0x78] sm:$0xff]   ;;  %v15_v33 = vld [vmem:[%s1777_s0] sm:$0xff] }
   0xa   :  { %1204 = vmatprep.subr.bf16.mxu1 %v1332_v10  ;;  %v1348_v26 = vld [vmem:[%s1776_s1 + $0xf0] sm:$0xff]   ;;  %v1352_v30 = vld [vmem:[%s1776_s1 + $0xf8] sm:$0xff]   ;;  %v19_v34 = vld [vmem:[%s1777_s0 + $0x20] sm:$0xff] }
   0xb   :  { %v1349_v27 = vld [vmem:[%s1776_s1 + $0x30] sm:$0xff]   ;;  %v1353_v31 = vld [vmem:[%s1776_s1 + $0x38] sm:$0xff]   ;;  %v16_v35 = vld [vmem:[%s1777_s0 + $0x8] sm:$0xff]  ;;  %v1064_v36 = vcombine.low %v15_v33, %v19_v34  ;;  %v1065_v37 = vcombine.high %v15_v33, %v19_v34 }
   0xc   :  { %1165 = vmatpush3.bf16.msra.mxu0 %v1333_v11  ;;  %v1350_v28 = vld [vmem:[%s1776_s1 + $0xb0] sm:$0xff]   ;;  %v1354_v32 = vld [vmem:[%s1776_s1 + $0xb8] sm:$0xff]   ;;  %v20_v38 = vld [vmem:[%s1777_s0 + $0x28] sm:$0xff] }
   0xd   :  { %1205 = vmatpush3.bf16.msra.mxu1 %v1334_v12  ;;  %1166 = vmatprep.subr.bf16.mxu0 %v1335_v13  ;;  %v1066_v39 = vcombine.low %v16_v35, %v20_v38  ;;  %v1067_v40 = vcombine.high %v16_v35, %v20_v38  ;;  %v1355_v41 = vld [vmem:[%s1776_s1 + $0x140] sm:$0xff]   ;;  %v1359_v45 = vld [vmem:[%s1776_s1 + $0x148] sm:$0xff]   ;;  %v1363_v57 = vld [vmem:[%s1776_s1 + $0x150] sm:$0xff]  }
   0xe   :  { %1206 = vmatprep.subr.bf16.mxu1 %v1336_v14  ;;  %799 = vmatprep.mubr.bf16.mxu0 %v1065_v37  ;;  %v1356_v42 = vld [vmem:[%s1776_s1 + $0x1c0] sm:$0xff]   ;;  %v1360_v46 = vld [vmem:[%s1776_s1 + $0x1c8] sm:$0xff]   ;;  %v1364_v58 = vld [vmem:[%s1776_s1 + $0x1d0] sm:$0xff]  }
   0xf   :  { %864 = vmatprep.mubr.bf16.mxu1 %v1067_v40  ;;  %v1357_v43 = vld [vmem:[%s1776_s1 + $0x100] sm:$0xff]   ;;  %v1361_v47 = vld [vmem:[%s1776_s1 + $0x108] sm:$0xff]   ;;  %v1365_v59 = vld [vmem:[%s1776_s1 + $0x110] sm:$0xff]  }
  0x10   :  { %1167 = vmatpush3.bf16.msra.mxu0 %v1337_v15  ;;  %v1358_v44 = vld [vmem:[%s1776_s1 + $0x180] sm:$0xff]   ;;  %v1362_v48 = vld [vmem:[%s1776_s1 + $0x188] sm:$0xff]   ;;  %v1366_v60 = vld [vmem:[%s1776_s1 + $0x190] sm:$0xff]  }
  0x11   :  { %1207 = vmatpush3.bf16.msra.mxu1 %v1338_v16  ;;  %1168 = vmatprep.subr.bf16.mxu0 %v1339_v17  ;;  %v23_v49 = vld [vmem:[%s1777_s0 + $0x40] sm:$0xff]  ;;  %v24_v52 = vld [vmem:[%s1777_s0 + $0x48] sm:$0xff]  ;;  %v1367_v61 = vld [vmem:[%s1776_s1 + $0x158] sm:$0xff]  }
  0x12   :  { %1208 = vmatprep.subr.bf16.mxu1 %v1340_v18  ;;  %v27_v50 = vld [vmem:[%s1777_s0 + $0x60] sm:$0xff]  ;;  %v28_v53 = vld [vmem:[%s1777_s0 + $0x68] sm:$0xff]  ;;  %v1368_v62 = vld [vmem:[%s1776_s1 + $0x1d8] sm:$0xff]  }
  0x13   :  { %v1073_v51 = vcombine.high %v23_v49, %v27_v50  ;;  %v1072_v54 = vcombine.low %v23_v49, %v27_v50  ;;  %v1075_v55 = vcombine.high %v24_v52, %v28_v53  ;;  %v1074_v56 = vcombine.low %v24_v52, %v28_v53  ;;  %v1369_v63 = vld [vmem:[%s1776_s1 + $0x118] sm:$0xff]   ;;  %v31_v1 = vld [vmem:[%s1777_s0 + $0x80] sm:$0xff]  ;;  %v32_v3 = vld [vmem:[%s1777_s0 + $0x88] sm:$0xff] }
  0x14   :  { %1169 = vmatpush3.bf16.msra.mxu0 %v1341_v19  ;;  %v1370_v0 = vld [vmem:[%s1776_s1 + $0x198] sm:$0xff]   ;;  %v35_v2 = vld [vmem:[%s1777_s0 + $0xa0] sm:$0xff]  ;;  %v36_v4 = vld [vmem:[%s1777_s0 + $0xa8] sm:$0xff] }
  0x15   :  { %1209 = vmatpush3.bf16.msra.mxu1 %v1342_v20  ;;  %1170 = vmatprep.subr.bf16.mxu0 %v1343_v21  ;;  %v1081_v5 = vcombine.high %v31_v1, %v35_v2  ;;  %v1083_v6 = vcombine.high %v32_v3, %v36_v4  ;;  %v1080_v7 = vcombine.low %v31_v1, %v35_v2  ;;  %v1371_v9 = vld [vmem:[%s1776_s1 + $0x160] sm:$0xff]   ;;  %v1375_v13 = vld [vmem:[%s1776_s1 + $0x168] sm:$0xff]   ;;  %v17_v33 = vld [vmem:[%s1777_s0 + $0x10] sm:$0xff] }
  0x16   :  { %1210 = vmatprep.subr.bf16.mxu1 %v1344_v22  ;;  %v1082_v8 = vcombine.low %v32_v3, %v36_v4  ;;  %v1372_v10 = vld [vmem:[%s1776_s1 + $0x1e0] sm:$0xff]   ;;  %v1376_v14 = vld [vmem:[%s1776_s1 + $0x1e8] sm:$0xff]   ;;  %v21_v34 = vld [vmem:[%s1777_s0 + $0x30] sm:$0xff] }
  0x17   :  { %v1373_v11 = vld [vmem:[%s1776_s1 + $0x120] sm:$0xff]   ;;  %v1377_v15 = vld [vmem:[%s1776_s1 + $0x128] sm:$0xff]   ;;  %v1068_v35 = vcombine.low %v17_v33, %v21_v34  ;;  %v18_v37 = vld [vmem:[%s1777_s0 + $0x18] sm:$0xff] }
  0x18   :  { %1171 = vmatpush3.bf16.msra.mxu0 %v1345_v23  ;;  %v1374_v12 = vld [vmem:[%s1776_s1 + $0x1a0] sm:$0xff]   ;;  %v1378_v16 = vld [vmem:[%s1776_s1 + $0x1a8] sm:$0xff]   ;;  %v22_v38 = vld [vmem:[%s1777_s0 + $0x38] sm:$0xff] }
  0x19   :  { %1211 = vmatpush3.bf16.msra.mxu1 %v1346_v24  ;;  %1172 = vmatprep.subr.bf16.mxu0 %v1347_v25  ;;  %v39_v17 = vld [vmem:[%s1777_s0 + $0xc0] sm:$0xff]  ;;  %v40_v19 = vld [vmem:[%s1777_s0 + $0xc8] sm:$0xff]  ;;  %v1379_v25 = vld [vmem:[%s1776_s1 + $0x170] sm:$0xff]   ;;  %v1070_v40 = vcombine.low %v18_v37, %v22_v38 }
  0x1a   :  { %1212 = vmatprep.subr.bf16.mxu1 %v1348_v26  ;;  %v43_v18 = vld [vmem:[%s1777_s0 + $0xe0] sm:$0xff]  ;;  %v44_v21 = vld [vmem:[%s1777_s0 + $0xe8] sm:$0xff]  ;;  %v1380_v26 = vld [vmem:[%s1776_s1 + $0x1f0] sm:$0xff]  }
  0x1b   :  { %v1089_v20 = vcombine.high %v39_v17, %v43_v18  ;;  %v1088_v22 = vcombine.low %v39_v17, %v43_v18  ;;  %v1091_v23 = vcombine.high %v40_v19, %v44_v21  ;;  %v1090_v24 = vcombine.low %v40_v19, %v44_v21  ;;  %v37_v49 = vld [vmem:[%s1777_s0 + $0xb0] sm:$0xff]  ;;  %v38_v52 = vld [vmem:[%s1777_s0 + $0xb8] sm:$0xff]  ;;  %v176_v53 = vld [vmem:[%s1778_s2 + $0x8] sm:$0xff] }
  0x1c   :  { %1173 = vmatpush3.bf16.msra.mxu0 %v1349_v27  ;;  %v1381_v27 = vld [vmem:[%s1776_s1 + $0x130] sm:$0xff]   ;;  %v182_v3 = vld [vmem:[%s1778_s2 + $0x38] sm:$0xff] }
  0x1d   :  { %1213 = vmatpush3.bf16.msra.mxu1 %v1350_v28  ;;  %1174 = vmatprep.subr.bf16.mxu0 %v1351_v29  ;;  %v1382_v28 = vld [vmem:[%s1776_s1 + $0x1b0] sm:$0xff]   ;;  %v1383_v29 = vld [vmem:[%s1776_s1 + $0x178] sm:$0xff]  }
  0x1e   :  { %1214 = vmatprep.subr.bf16.mxu1 %v1352_v30  ;;  %v1384_v30 = vld [vmem:[%s1776_s1 + $0x1f8] sm:$0xff]   ;;  %v177_v50 = vld [vmem:[%s1778_s2 + $0x10] sm:$0xff] }
  0x1f   :  { %195 = vperm.xlu1 %1322, %v177_v50   ;;  %v181_v1 = vld [vmem:[%s1778_s2 + $0x30] sm:$0xff] }
  0x20   :  { %1175 = vmatpush3.bf16.msra.mxu0 %v1353_v31  ;;  %v1385_v31 = vld [vmem:[%s1776_s1 + $0x138] sm:$0xff]  }
  0x21   :  { %1215 = vmatpush3.bf16.msra.mxu1 %v1354_v32  ;;  %1240 = vmatprep.subr.bf16.mxu0 %v1355_v41  ;;  %v1386_v32 = vld [vmem:[%s1776_s1 + $0x1b8] sm:$0xff]   ;;  %v1071_v41 = vcombine.high %v18_v37, %v22_v38 }
  0x22   :  { %1280 = vmatprep.subr.bf16.mxu1 %v1356_v42  ;;  %v29_v42 = vld [vmem:[%s1777_s0 + $0x70] sm:$0xff] }
  0x23   :  { %800 = vmatmul.mubr.bf16.vlgmr.msra.gmra.mrb[0].mxu0 %v1064_v36  ;;  %v1069_v36 = vcombine.high %v17_v33, %v21_v34 }
  0x24   :  { %865 = vmatmul.mubr.bf16.vlgmr.msra.gmra.mrb[0].mxu1 %v1066_v39  ;;  %1241 = vmatpush3.bf16.msra.mxu0 %v1357_v43  ;;  %v25_v39 = vld [vmem:[%s1777_s0 + $0x50] sm:$0xff]  ;;  %v26_v43 = vld [vmem:[%s1777_s0 + $0x58] sm:$0xff] }
  0x25   :  { %1281 = vmatpush3.bf16.msra.mxu1 %v1358_v44  ;;  %1242 = vmatprep.subr.bf16.mxu0 %v1359_v45  ;;  %v30_v44 = vld [vmem:[%s1777_s0 + $0x78] sm:$0xff]  ;;  %v1077_v45 = vcombine.high %v25_v39, %v29_v42 }
  0x26   :  { %1282 = vmatprep.subr.bf16.mxu1 %v1360_v46  ;;  %807 = vmatprep.mubr.bf16.mxu0 %v1073_v51  ;;  %v1079_v46 = vcombine.high %v26_v43, %v30_v44  ;;  %v34_v51 = vld [vmem:[%s1777_s0 + $0x98] sm:$0xff] }
  0x27   :  { %872 = vmatprep.mubr.bf16.mxu1 %v1075_v55  ;;  %v178_v55 = vld [vmem:[%s1778_s2 + $0x18] sm:$0xff]  ;;  %v1086_v4 = vcombine.low %v34_v51, %v38_v52 }
  0x28   :  { %1243 = vmatpush3.bf16.msra.mxu0 %v1361_v47  ;;  %v175_v47 = vld [vmem:[%s1778_s2] sm:$0xff]  ;;  %200 = vperm.xlu1 %1322, %v178_v55  }
  0x29   :  { %1283 = vmatpush3.bf16.msra.mxu1 %v1362_v48  ;;  %1244 = vmatprep.subr.bf16.mxu0 %v1363_v57  ;;  %v33_v48 = vld [vmem:[%s1777_s0 + $0x90] sm:$0xff] }
  0x2a   :  { %1284 = vmatprep.subr.bf16.mxu1 %v1364_v58  ;;  %185 = vperm.xlu0 %1321, %v175_v47   ;;  %v1085_v57 = vcombine.high %v33_v48, %v37_v49  ;;  %v1087_v58 = vcombine.high %v34_v51, %v38_v52  ;;  %v1084_v2 = vcombine.low %v33_v48, %v37_v49 }
  0x2b   :  { %808 = vmatmul.mubr.bf16.gmra.mrb[4].mxu0 %v1072_v54  ;;  %v1076_v54 = vcombine.low %v25_v39, %v29_v42 }
  0x2c   :  { %873 = vmatmul.mubr.bf16.gmra.mrb[4].mxu1 %v1074_v56  ;;  %1245 = vmatpush3.bf16.msra.mxu0 %v1365_v59  ;;  %v1078_v56 = vcombine.low %v26_v43, %v30_v44  ;;  %v179_v59 = vld [vmem:[%s1778_s2 + $0x20] sm:$0xff] }
  0x2d   :  { %1285 = vmatpush3.bf16.msra.mxu1 %v1366_v60  ;;  %1246 = vmatprep.subr.bf16.mxu0 %v1367_v61  ;;  %v180_v60 = vld [vmem:[%s1778_s2 + $0x28] sm:$0xff]  ;;  %v41_v61 = vld [vmem:[%s1777_s0 + $0xd0] sm:$0xff] }
  0x2e   :  { %1286 = vmatprep.subr.bf16.mxu1 %v1368_v62  ;;  %815 = vmatprep.mubr.bf16.mxu0 %v1081_v5  ;;  %v45_v62 = vld [vmem:[%s1777_s0 + $0xf0] sm:$0xff] }
  0x2f   :  { %880 = vmatprep.mubr.bf16.mxu1 %v1083_v6  ;;  %190 = vperm.xlu0 %1321, %v176_v53   ;;  %v1093_v5 = vcombine.high %v41_v61, %v45_v62 }
  0x30   :  { %1247 = vmatpush3.bf16.msra.mxu0 %v1369_v63  ;;  %v42_v63 = vld [vmem:[%s1777_s0 + $0xd8] sm:$0xff]  ;;  %210 = vperm.xlu1 %1322, %v180_v60  }
  0x31   :  { %1287 = vmatpush3.bf16.msra.mxu1 %v1370_v0  ;;  %1248 = vmatprep.subr.bf16.mxu0 %v1371_v9  ;;  %v46_v0 = vld [vmem:[%s1777_s0 + $0xf8] sm:$0xff] }
  0x32   :  { %1288 = vmatprep.subr.bf16.mxu1 %v1372_v10  ;;  %v1095_v6 = vcombine.high %v42_v63, %v46_v0 }
  0x33   :  { %816 = vmatmul.mubr.bf16.gmra.mrb[8].mxu0 %v1080_v7  ;;  %205 = vperm.xlu0 %1321, %v179_v59   ;;  %v1092_v7 = vcombine.low %v41_v61, %v45_v62 }
  0x34   :  { %881 = vmatmul.mubr.bf16.gmra.mrb[8].mxu1 %v1082_v8  ;;  %1249 = vmatpush3.bf16.msra.mxu0 %v1373_v11  ;;  %v1094_v8 = vcombine.low %v42_v63, %v46_v0 }
  0x35   :  { %1289 = vmatpush3.bf16.msra.mxu1 %v1374_v12  ;;  %1250 = vmatprep.subr.bf16.mxu0 %v1375_v13 }
  0x36   :  { %1290 = vmatprep.subr.bf16.mxu1 %v1376_v14  ;;  %823 = vmatprep.mubr.bf16.mxu0 %v1089_v20 }
  0x37   :  { %888 = vmatprep.mubr.bf16.mxu1 %v1091_v23  ;;  %215 = vperm.xlu0 %1321, %v181_v1  }
  0x38   :  { %1251 = vmatpush3.bf16.msra.mxu0 %v1377_v15  ;;  %220 = vperm.xlu1 %1322, %v182_v3  }
  0x39   :  { %1291 = vmatpush3.bf16.msra.mxu1 %v1378_v16  ;;  %1252 = vmatprep.subr.bf16.mxu0 %v1379_v25 }
  0x3a   :  { %1292 = vmatprep.subr.bf16.mxu1 %v1380_v26 }
  0x3b   :  { %824 = vmatmul.mubr.bf16.gmra.mrb[12].mxu0 %v1088_v22 }
  0x3c   :  { %889 = vmatmul.mubr.bf16.gmra.mrb[12].mxu1 %v1090_v24  ;;  %1253 = vmatpush3.bf16.msra.mxu0 %v1381_v27 }
  0x3d   :  { %1293 = vmatpush3.bf16.msra.mxu1 %v1382_v28  ;;  %1254 = vmatprep.subr.bf16.mxu0 %v1383_v29 }
  0x3e   :  { %1294 = vmatprep.subr.bf16.mxu1 %v1384_v30  ;;  %929 = vmatprep.mubr.bf16.mxu0 %v1069_v36 }
  0x3f   :  { %994 = vmatprep.mubr.bf16.mxu1 %v1071_v41 }
  0x40   :  { %1255 = vmatpush3.bf16.msra.mxu0 %v1385_v31 }
  0x41   :  { %1295 = vmatpush3.bf16.msra.mxu1 %v1386_v32 }
  0x43   :  { %930 = vmatmul.mubr.bf16.vlgmr.msra.gmra.mrb[16].mxu0 %v1068_v35 }
  0x44   :  { %995 = vmatmul.mubr.bf16.vlgmr.msra.gmra.mrb[16].mxu1 %v1070_v40  ;;  %937 = vmatprep.mubr.bf16.mxu0 %v1077_v45 }
  0x45   :  { %1002 = vmatprep.mubr.bf16.mxu1 %v1079_v46 }
  0x4b   :  { %938 = vmatmul.mubr.bf16.gmra.mrb[20].mxu0 %v1076_v54 }
  0x4c   :  { %1003 = vmatmul.mubr.bf16.gmra.mrb[20].mxu1 %v1078_v56  ;;  %945 = vmatprep.mubr.bf16.mxu0 %v1085_v57 }
  0x4d   :  { %1010 = vmatprep.mubr.bf16.mxu1 %v1087_v58 }
  0x53   :  { %946 = vmatmul.mubr.bf16.gmra.mrb[24].mxu0 %v1084_v2 }
  0x54   :  { %1011 = vmatmul.mubr.bf16.gmra.mrb[24].mxu1 %v1086_v4  ;;  %953 = vmatprep.mubr.bf16.mxu0 %v1093_v5 }
  0x55   :  { %1018 = vmatprep.mubr.bf16.mxu1 %v1095_v6 }
  0x5b   :  { %954 = vmatmul.mubr.bf16.gmra.mrb[28].mxu0 %v1092_v7 }
  0x5c   :  { %1019 = vmatmul.mubr.bf16.gmra.mrb[28].mxu1 %v1094_v8 }
  0x9e   :  { %v196_v10 = vpop.permute.xlu1 %195 }
  0xa7   :  { %v201_v29 = vpop.permute.xlu1 %200 }
  0xa9   :  { %v186_v9 = vpop.permute.xlu0 %185 }
  0xae   :  { %v191_v12 = vpop.permute.xlu0 %190 }
  0xaf   :  { %v211_v46 = vpop.permute.xlu1 %210 }
  0xb2   :  { %v206_v45 = vpop.permute.xlu0 %205 }
  0xb6   :  { %v216_v63 = vpop.permute.xlu0 %215 }
  0xb7   :  { %v221_v1 = vpop.permute.xlu1 %220 }
  0xf6   :  { %v1176_v11 = vpop.f32.mrb[0].mxu0 }
  0xf7   :  { %v1216_v13 = vpop.f32.mrb[0].mxu1  ;;  %v1177_v14 = vpop.f32.mrb[1].mxu0 }
  0xf8   :  { %v1178_v15 = vadd.f32 %v1177_v14, %v1176_v11  ;;  %v1217_v16 = vpop.f32.mrb[1].mxu1  ;;  %v1179_v17 = vpop.f32.mrb[2].mxu0 }
  0xf9   :  { %v1218_v18 = vadd.f32 %v1217_v16, %v1216_v13  ;;  %v1219_v19 = vpop.f32.mrb[2].mxu1  ;;  %v1180_v20 = vpop.f32.mrb[3].mxu0 }
  0xfa   :  { %v802_v21 = vadd.f32 %v1178_v15, %v186_v9  ;;  %v1181_v22 = vadd.f32 %v1180_v20, %v1179_v17  ;;  %v1220_v23 = vpop.f32.mrb[3].mxu1 }
  0xfb   :  { %v1221_v24 = vadd.f32 %v1220_v23, %v1219_v19 }
  0xfc   :  { %v1720_v25 = vadd.f32 %v1218_v18, %v802_v21  ;;  %v805_v26 = vadd.f32 %v1181_v22, %v191_v12 }
  0xfe   :  { %v1722_v27 = vadd.f32 %v1221_v24, %v805_v26  ;;  %v1182_v28 = vpop.f32.mrb[4].mxu0 }
  0xff   :  { %v1222_v30 = vpop.f32.mrb[4].mxu1  ;;  %v1183_v31 = vpop.f32.mrb[5].mxu0 }
 0x100   :  { %v1184_v32 = vadd.f32 %v1183_v31, %v1182_v28  ;;  %v1223_v33 = vpop.f32.mrb[5].mxu1  ;;  %v1185_v34 = vpop.f32.mrb[6].mxu0 }
 0x101   :  { %v1224_v35 = vadd.f32 %v1223_v33, %v1222_v30  ;;  %v1225_v36 = vpop.f32.mrb[6].mxu1  ;;  %v1186_v37 = vpop.f32.mrb[7].mxu0 }
 0x102   :  { %v810_v38 = vadd.f32 %v1184_v32, %v196_v10  ;;  %v1187_v39 = vadd.f32 %v1186_v37, %v1185_v34  ;;  %v1226_v40 = vpop.f32.mrb[7].mxu1 }
 0x103   :  { %v1227_v41 = vadd.f32 %v1226_v40, %v1225_v36 }
 0x104   :  { %v1724_v42 = vadd.f32 %v1224_v35, %v810_v38  ;;  %v813_v43 = vadd.f32 %v1187_v39, %v201_v29 }
 0x106   :  { %v1726_v44 = vadd.f32 %v1227_v41, %v813_v43  ;;  %v1188_v47 = vpop.f32.mrb[8].mxu0 }
 0x107   :  { %v1228_v48 = vpop.f32.mrb[8].mxu1  ;;  %v1189_v49 = vpop.f32.mrb[9].mxu0 }
 0x108   :  { %v1229_v50 = vpop.f32.mrb[9].mxu1  ;;  %v1190_v51 = vadd.f32 %v1189_v49, %v1188_v47  ;;  %v1191_v53 = vpop.f32.mrb[10].mxu0 }
 0x109   :  { %v1230_v52 = vadd.f32 %v1229_v50, %v1228_v48  ;;  %v1231_v54 = vpop.f32.mrb[10].mxu1  ;;  %v1192_v55 = vpop.f32.mrb[11].mxu0 }
 0x10a   :  { %v1232_v56 = vpop.f32.mrb[11].mxu1  ;;  %v818_v57 = vadd.f32 %v1190_v51, %v206_v45  ;;  %v1193_v58 = vadd.f32 %v1192_v55, %v1191_v53 }
 0x10b   :  { %v1233_v59 = vadd.f32 %v1232_v56, %v1231_v54 }
 0x10c   :  { %v1728_v60 = vadd.f32 %v1230_v52, %v818_v57  ;;  %v821_v61 = vadd.f32 %v1193_v58, %v211_v46 }
 0x10e   :  { %v1730_v62 = vadd.f32 %v1233_v59, %v821_v61  ;;  %v1194_v0 = vpop.f32.mrb[12].mxu0 }
 0x10f   :  { %v1234_v2 = vpop.f32.mrb[12].mxu1  ;;  %v1195_v3 = vpop.f32.mrb[13].mxu0 }
 0x110   :  { %v1196_v4 = vadd.f32 %v1195_v3, %v1194_v0  ;;  %v1235_v5 = vpop.f32.mrb[13].mxu1  ;;  %v1197_v6 = vpop.f32.mrb[14].mxu0 }
 0x111   :  { %v1236_v7 = vadd.f32 %v1235_v5, %v1234_v2  ;;  %v1237_v8 = vpop.f32.mrb[14].mxu1  ;;  %v1198_v9 = vpop.f32.mrb[15].mxu0 }
 0x112   :  { %v826_v10 = vadd.f32 %v1196_v4, %v216_v63  ;;  %v1199_v11 = vadd.f32 %v1198_v9, %v1197_v6  ;;  %v1238_v12 = vpop.f32.mrb[15].mxu1 }
 0x113   :  { %v1239_v13 = vadd.f32 %v1238_v12, %v1237_v8 }
 0x114   :  { %v1732_v14 = vadd.f32 %v1236_v7, %v826_v10  ;;  %v829_v15 = vadd.f32 %v1199_v11, %v221_v1 }
 0x116   :  { %v1734_v16 = vadd.f32 %v1239_v13, %v829_v15  ;;  %v1256_v17 = vpop.f32.mrb[16].mxu0 }
 0x117   :  { %v1296_v18 = vpop.f32.mrb[16].mxu1  ;;  %v1257_v19 = vpop.f32.mrb[17].mxu0 }
 0x118   :  { %v1258_v20 = vadd.f32 %v1257_v19, %v1256_v17  ;;  %v1297_v21 = vpop.f32.mrb[17].mxu1  ;;  %v1259_v22 = vpop.f32.mrb[18].mxu0 }
 0x119   :  { %v1298_v23 = vadd.f32 %v1297_v21, %v1296_v18  ;;  %v1299_v24 = vpop.f32.mrb[18].mxu1  ;;  %v1260_v26 = vpop.f32.mrb[19].mxu0 }
 0x11a   :  { %v932_v28 = vadd.f32 %v1258_v20, %v1720_v25  ;;  %v1261_v29 = vadd.f32 %v1260_v26, %v1259_v22  ;;  %v1300_v30 = vpop.f32.mrb[19].mxu1 }
 0x11b   :  { %v1301_v31 = vadd.f32 %v1300_v30, %v1299_v24 }
 0x11c   :  { %v997_v32 = vadd.f32 %v1298_v23, %v932_v28  ;;  %v935_v33 = vadd.f32 %v1261_v29, %v1722_v27 }
 0x11e   :  { %vm1027_vm0 = vcmp.gt.f32.partialorder %v997_v32, 0.0  ;;  %v1035_v34 = vmul.f32 0.2, %v997_v32  ;;  %v1000_v35 = vadd.f32 %v1301_v31, %v935_v33  ;;  %v1262_v36 = vpop.f32.mrb[20].mxu0 }
 0x11f   :  { %v1302_v37 = vpop.f32.mrb[20].mxu1  ;;  %v1263_v38 = vpop.f32.mrb[21].mxu0 }
 0x120   :  { %v1043_v39 = vsel %vm1027_vm0, %v997_v32, %v1035_v34  ;;  %vm1028_vm2 = vcmp.gt.f32.partialorder %v1000_v35, 0.0  ;;  %v1036_v40 = vmul.f32 0.2, %v1000_v35  ;;  %v1264_v41 = vadd.f32 %v1263_v38, %v1262_v36  ;;  %v1303_v43 = vpop.f32.mrb[21].mxu1  ;;  %v1265_v45 = vpop.f32.mrb[22].mxu0 }
 0x121   :  { %1052 = vst.msk [vmem:[%s1779_s3] sm:$0xff] %vm1051_vm1, %v1043_v39  ;;  %v1304_v25 = vadd.f32 %v1303_v43, %v1302_v37  ;;  %v1305_v27 = vpop.f32.mrb[22].mxu1  ;;  %v1266_v46 = vpop.f32.mrb[23].mxu0 }
 0x122   :  { %v1044_v47 = vsel %vm1028_vm2, %v1000_v35, %v1036_v40  ;;  %v940_v48 = vadd.f32 %v1264_v41, %v1724_v42  ;;  %v1267_v49 = vadd.f32 %v1266_v46, %v1265_v45  ;;  %v1306_v50 = vpop.f32.mrb[23].mxu1 }
 0x123   :  { %1053 = vst.msk [vmem:[%s1779_s3 + $0x8] sm:$0xff] %vm1051_vm1, %v1044_v47  ;;  %v1307_v51 = vadd.f32 %v1306_v50, %v1305_v27 }
 0x124   :  { %v1005_v52 = vadd.f32 %v1304_v25, %v940_v48  ;;  %v943_v53 = vadd.f32 %v1267_v49, %v1726_v44 }
 0x126   :  { %vm1029_vm3 = vcmp.gt.f32.partialorder %v1005_v52, 0.0  ;;  %v1037_v54 = vmul.f32 0.2, %v1005_v52  ;;  %v1008_v55 = vadd.f32 %v1307_v51, %v943_v53  ;;  %v1268_v56 = vpop.f32.mrb[24].mxu0 }
 0x127   :  { %v1308_v57 = vpop.f32.mrb[24].mxu1  ;;  %v1269_v58 = vpop.f32.mrb[25].mxu0 }
 0x128   :  { %v1045_v59 = vsel %vm1029_vm3, %v1005_v52, %v1037_v54  ;;  %vm1030_vm4 = vcmp.gt.f32.partialorder %v1008_v55, 0.0  ;;  %v1038_v42 = vmul.f32 0.2, %v1008_v55  ;;  %v1270_v61 = vadd.f32 %v1269_v58, %v1268_v56  ;;  %v1309_v63 = vpop.f32.mrb[25].mxu1  ;;  %v1271_v0 = vpop.f32.mrb[26].mxu0 }
 0x129   :  { %1054 = vst.msk [vmem:[%s1779_s3 + $0x10] sm:$0xff] %vm1051_vm1, %v1045_v59  ;;  %v1310_v1 = vadd.f32 %v1309_v63, %v1308_v57  ;;  %v1311_v2 = vpop.f32.mrb[26].mxu1  ;;  %v1272_v44 = vpop.f32.mrb[27].mxu0 }
 0x12a   :  { %v1046_v3 = vsel %vm1030_vm4, %v1008_v55, %v1038_v42  ;;  %v948_v4 = vadd.f32 %v1270_v61, %v1728_v60  ;;  %v1273_v5 = vadd.f32 %v1272_v44, %v1271_v0  ;;  %v1312_v6 = vpop.f32.mrb[27].mxu1 }
 0x12b   :  { %1055 = vst.msk [vmem:[%s1779_s3 + $0x18] sm:$0xff] %vm1051_vm1, %v1046_v3  ;;  %v1313_v7 = vadd.f32 %v1312_v6, %v1311_v2 }
 0x12c   :  { %v1013_v8 = vadd.f32 %v1310_v1, %v948_v4  ;;  %v951_v9 = vadd.f32 %v1273_v5, %v1730_v62 }
 0x12e   :  { %vm1031_vm5 = vcmp.gt.f32.partialorder %v1013_v8, 0.0  ;;  %v1039_v10 = vmul.f32 0.2, %v1013_v8  ;;  %v1016_v11 = vadd.f32 %v1313_v7, %v951_v9  ;;  %v1274_v12 = vpop.f32.mrb[28].mxu0 }
 0x12f   :  { %v1314_v13 = vpop.f32.mrb[28].mxu1  ;;  %v1275_v15 = vpop.f32.mrb[29].mxu0 }
 0x130   :  { %v1047_v17 = vsel %vm1031_vm5, %v1013_v8, %v1039_v10  ;;  %vm1032_vm6 = vcmp.gt.f32.partialorder %v1016_v11, 0.0  ;;  %v1040_v60 = vmul.f32 0.2, %v1016_v11  ;;  %v1276_v18 = vadd.f32 %v1275_v15, %v1274_v12  ;;  %v1315_v19 = vpop.f32.mrb[29].mxu1  ;;  %v1277_v20 = vpop.f32.mrb[30].mxu0 }
 0x131   :  { %1056 = vst.msk [vmem:[%s1779_s3 + $0x20] sm:$0xff] %vm1051_vm1, %v1047_v17  ;;  %v1316_v21 = vadd.f32 %v1315_v19, %v1314_v13  ;;  %v1317_v22 = vpop.f32.mrb[30].mxu1  ;;  %v1278_v62 = vpop.f32.mrb[31].mxu0 }
 0x132   :  { %v1048_v23 = vsel %vm1032_vm6, %v1016_v11, %v1040_v60  ;;  %v956_v24 = vadd.f32 %v1276_v18, %v1732_v14  ;;  %v1279_v26 = vadd.f32 %v1278_v62, %v1277_v20  ;;  %v1318_v28 = vpop.f32.mrb[31].mxu1 }
 0x133   :  { %1057 = vst.msk [vmem:[%s1779_s3 + $0x28] sm:$0xff] %vm1051_vm1, %v1048_v23  ;;  %v1319_v29 = vadd.f32 %v1318_v28, %v1317_v22 }
 0x134   :  { %v1021_v30 = vadd.f32 %v1316_v21, %v956_v24  ;;  %v959_v31 = vadd.f32 %v1279_v26, %v1734_v16 }
 0x136   :  { %vm1033_vm7 = vcmp.gt.f32.partialorder %v1021_v30, 0.0  ;;  %v1041_v32 = vmul.f32 0.2, %v1021_v30  ;;  %v1024_v33 = vadd.f32 %v1319_v29, %v959_v31 }
 0x138   :  { %v1049_v34 = vsel %vm1033_vm7, %v1021_v30, %v1041_v32  ;;  %vm1034_vm8 = vcmp.gt.f32.partialorder %v1024_v33, 0.0  ;;  %v1042_v35 = vmul.f32 0.2, %v1024_v33 }
 0x139   :  { %1058 = vst.msk [vmem:[%s1779_s3 + $0x30] sm:$0xff] %vm1051_vm1, %v1049_v34 }
 0x13a   :  { %v1050_v14 = vsel %vm1034_vm8, %v1024_v33, %v1042_v35 }
 0x13b   :  { %1059 = vst.msk [vmem:[%s1779_s3 + $0x38] sm:$0xff] %vm1051_vm1, %v1050_v14 }

// kernel: single_disc_forward.9
= control target key start
LH: loop header
LB: loop body
LE: loop exit
PB: predicated region body
PF: predicated region fallthrough
CT: control target
= control target key end

     0   :  { %v984_v1 = vmov 0   ;;  %v152_v24 = vlaneseq  ;;  %v985_v25 = vmov 1966171168   ;;  %vm758_vm0 = vcmask 57344   ;;  %s1224_s1 = inlined_call_operand.vmem [shape: bf16[1024,8], index: 1, kind: input, shape index: {}]   ;;  %s1225_s2 = inlined_call_operand.<no memory space> [shape: f32[1,1], index: 2, kind: input, shape index: {}]   ;;  %s1226_s0 = inlined_call_operand.vmem [shape: bf16[1,1024], index: 0, kind: input, shape index: {}]   ;;  %s1227_s3 = inlined_call_operand.vmem [shape: f32[1,8], index: 3, kind: output, shape index: {}]  }
   0x1   :  { %v919_v0 = vld [vmem:[%s1224_s1 + $0x40] sm:$0xff]   ;;  %918 = vset.pattern.permute.xlu0 %v984_v1  ;;  %v8_v2 = vstv %s1225_s2  ;;  %v923_v6 = vld [vmem:[%s1224_s1 + $0x48] sm:$0xff]   ;;  %v927_v10 = vld [vmem:[%s1224_s1 + $0x50] sm:$0xff]   ;;  %v159_v26 = vunpack.c.l.s4 %v985_v25 }
   0x2   :  { %v920_v3 = vld [vmem:[%s1224_s1 + $0xc0] sm:$0xff]   ;;  %9 = vst [vmem:[#allocation2] sm:$0x1] %v8_v2  ;;  %828 = vmatprep.subr.bf16.mxu0 %v919_v0  ;;  %v924_v7 = vld [vmem:[%s1224_s1 + $0xc8] sm:$0xff]   ;;  %v928_v11 = vld [vmem:[%s1224_s1 + $0xd0] sm:$0xff]   ;;  %v1087_v31 = vshrl.u32 %v152_v24, 7 }
   0x3   :  { %v921_v4 = vld [vmem:[%s1224_s1] sm:$0xff]   ;;  %850 = vmatprep.subr.bf16.mxu1 %v920_v3  ;;  %v925_v8 = vld [vmem:[%s1224_s1 + $0x8] sm:$0xff]   ;;  %v929_v12 = vld [vmem:[%s1224_s1 + $0x10] sm:$0xff]   ;;  %v160_v32 = vunpack.c.0.s8 %v159_v26 }
   0x4   :  { %v922_v5 = vld [vmem:[%s1224_s1 + $0x80] sm:$0xff]   ;;  %829 = vmatpush3.bf16.msra.mxu0 %v921_v4  ;;  %v926_v9 = vld [vmem:[%s1224_s1 + $0x88] sm:$0xff]   ;;  %v930_v13 = vld [vmem:[%s1224_s1 + $0x90] sm:$0xff]  }
   0x5   :  { %851 = vmatpush3.bf16.msra.mxu1 %v922_v5  ;;  %830 = vmatprep.subr.bf16.mxu0 %v923_v6  ;;  %v931_v14 = vld [vmem:[%s1224_s1 + $0x58] sm:$0xff]   ;;  %v935_v18 = vld [vmem:[%s1224_s1 + $0x60] sm:$0xff]   ;;  %v939_v22 = vld [vmem:[%s1224_s1 + $0x68] sm:$0xff]   ;;  %v1102_v37 = vsub.s32 %v160_v32, %v1087_v31 }
   0x6   :  { %852 = vmatprep.subr.bf16.mxu1 %v924_v7  ;;  %v932_v15 = vld [vmem:[%s1224_s1 + $0xd8] sm:$0xff]   ;;  %v936_v19 = vld [vmem:[%s1224_s1 + $0xe0] sm:$0xff]   ;;  %v940_v23 = vld [vmem:[%s1224_s1 + $0xe8] sm:$0xff]  }
   0x7   :  { %v933_v16 = vld [vmem:[%s1224_s1 + $0x18] sm:$0xff]   ;;  %v937_v20 = vld [vmem:[%s1224_s1 + $0x20] sm:$0xff]   ;;  %v941_v27 = vld [vmem:[%s1224_s1 + $0x28] sm:$0xff]  }
   0x8   :  { %831 = vmatpush3.bf16.msra.mxu0 %v925_v8  ;;  %v934_v17 = vld [vmem:[%s1224_s1 + $0x98] sm:$0xff]   ;;  %v938_v21 = vld [vmem:[%s1224_s1 + $0xa0] sm:$0xff]   ;;  %v942_v28 = vld [vmem:[%s1224_s1 + $0xa8] sm:$0xff]  }
   0x9   :  { %853 = vmatpush3.bf16.msra.mxu1 %v926_v9  ;;  %832 = vmatprep.subr.bf16.mxu0 %v927_v10  ;;  %v943_v29 = vld [vmem:[%s1224_s1 + $0x70] sm:$0xff]   ;;  %v947_v35 = vld [vmem:[%s1224_s1 + $0x78] sm:$0xff]   ;;  %v17_v40 = vld [vmem:[%s1226_s0] sm:$0xff] }
   0xa   :  { %854 = vmatprep.subr.bf16.mxu1 %v928_v11  ;;  %v944_v30 = vld [vmem:[%s1224_s1 + $0xf0] sm:$0xff]   ;;  %v948_v36 = vld [vmem:[%s1224_s1 + $0xf8] sm:$0xff]   ;;  %v157_v41 = vcombine.high %v17_v40, %v17_v40  ;;  %v164_v42 = vrot.slane %v17_v40, %v1102_v37  ;;  %v952_v43 = vld [vmem:[%s1224_s1 + $0x140] sm:$0xff]  }
   0xb   :  { %v945_v33 = vld [vmem:[%s1224_s1 + $0x30] sm:$0xff]   ;;  %v949_v38 = vld [vmem:[%s1224_s1 + $0x38] sm:$0xff]   ;;  %v953_v44 = vld [vmem:[%s1224_s1 + $0x1c0] sm:$0xff]  }
   0xc   :  { %833 = vmatpush3.bf16.msra.mxu0 %v929_v12  ;;  %v946_v34 = vld [vmem:[%s1224_s1 + $0xb0] sm:$0xff]   ;;  %v950_v39 = vld [vmem:[%s1224_s1 + $0xb8] sm:$0xff]   ;;  %v172_v45 = vcombine.high %v164_v42, %v164_v42  ;;  %v180_v46 = vrot.slane %v164_v42, %v1102_v37  ;;  %v1122_v47 = vrot.slane %v157_v41, %v1102_v37  ;;  %v954_v49 = vld [vmem:[%s1224_s1 + $0x100] sm:$0xff]  }
   0xd   :  { %855 = vmatpush3.bf16.msra.mxu1 %v930_v13  ;;  %834 = vmatprep.subr.bf16.mxu0 %v931_v14  ;;  %v956_v52 = vld [vmem:[%s1224_s1 + $0x148] sm:$0xff]   ;;  %v955_v54 = vld [vmem:[%s1224_s1 + $0x180] sm:$0xff]   ;;  %v960_v59 = vld [vmem:[%s1224_s1 + $0x150] sm:$0xff]  }
   0xe   :  { %856 = vmatprep.subr.bf16.mxu1 %v932_v15  ;;  %v194_v48 = vrot.slane %v172_v45, %v1102_v37  ;;  %v173_v50 = vcombine.high %v1122_v47, %v1122_v47  ;;  %v202_v51 = vcombine.high %v180_v46, %v180_v46  ;;  %v957_v56 = vld [vmem:[%s1224_s1 + $0x1c8] sm:$0xff]   ;;  %v961_v61 = vld [vmem:[%s1224_s1 + $0x1d0] sm:$0xff]   ;;  %v964_v63 = vld [vmem:[%s1224_s1 + $0x158] sm:$0xff]  }
   0xf   :  { %v958_v57 = vld [vmem:[%s1224_s1 + $0x108] sm:$0xff]   ;;  %v962_v62 = vld [vmem:[%s1224_s1 + $0x110] sm:$0xff]   ;;  %v965_v1 = vld [vmem:[%s1224_s1 + $0x1d8] sm:$0xff]  }
  0x10   :  { %835 = vmatpush3.bf16.msra.mxu0 %v933_v16  ;;  %630 = vmatprep.mubr.bf16.mxu0 %v194_v48  ;;  %v204_v53 = vcombine.high %v194_v48, %v194_v48  ;;  %v201_v55 = vrot.slane %v173_v50, %v1102_v37  ;;  %v959_v60 = vld [vmem:[%s1224_s1 + $0x188] sm:$0xff]   ;;  %v963_v0 = vld [vmem:[%s1224_s1 + $0x190] sm:$0xff]   ;;  %v966_v2 = vld [vmem:[%s1224_s1 + $0x118] sm:$0xff]  }
  0x11   :  { %857 = vmatpush3.bf16.msra.mxu1 %v934_v17  ;;  %836 = vmatprep.subr.bf16.mxu0 %v935_v18  ;;  %v968_v3 = vld [vmem:[%s1224_s1 + $0x160] sm:$0xff]   ;;  %v967_v4 = vld [vmem:[%s1224_s1 + $0x198] sm:$0xff]   ;;  %v972_v7 = vld [vmem:[%s1224_s1 + $0x168] sm:$0xff]  }
  0x12   :  { %858 = vmatprep.subr.bf16.mxu1 %v936_v19  ;;  %670 = vmatprep.mubr.bf16.mxu1 %v204_v53  ;;  %v205_v58 = vcombine.high %v201_v55, %v201_v55  ;;  %v969_v5 = vld [vmem:[%s1224_s1 + $0x1e0] sm:$0xff]   ;;  %v973_v9 = vld [vmem:[%s1224_s1 + $0x1e8] sm:$0xff]   ;;  %v976_v11 = vld [vmem:[%s1224_s1 + $0x170] sm:$0xff]  }
  0x13   :  { %v970_v6 = vld [vmem:[%s1224_s1 + $0x120] sm:$0xff]   ;;  %v974_v10 = vld [vmem:[%s1224_s1 + $0x128] sm:$0xff]   ;;  %v977_v13 = vld [vmem:[%s1224_s1 + $0x1f0] sm:$0xff]  }
  0x14   :  { %837 = vmatpush3.bf16.msra.mxu0 %v937_v20  ;;  %v971_v8 = vld [vmem:[%s1224_s1 + $0x1a0] sm:$0xff]   ;;  %v975_v12 = vld [vmem:[%s1224_s1 + $0x1a8] sm:$0xff]   ;;  %v978_v14 = vld [vmem:[%s1224_s1 + $0x130] sm:$0xff]   ;;  %v187_v20 = vrot.slane %v1122_v47, %v1102_v37 }
  0x15   :  { %859 = vmatpush3.bf16.msra.mxu1 %v938_v21  ;;  %838 = vmatprep.subr.bf16.mxu0 %v939_v22  ;;  %v980_v15 = vld [vmem:[%s1224_s1 + $0x178] sm:$0xff]   ;;  %v979_v16 = vld [vmem:[%s1224_s1 + $0x1b0] sm:$0xff]   ;;  %v146_v18 = vld [vmem:[#allocation2] sm:$0x1] }
  0x16   :  { %860 = vmatprep.subr.bf16.mxu1 %v940_v23  ;;  %v981_v17 = vld [vmem:[%s1224_s1 + $0x1f8] sm:$0xff]   ;;  %149 = vperm.xlu0 %918, %v146_v18   ;;  %v203_v22 = vcombine.high %v187_v20, %v187_v20  ;;  %v154_v23 = vsub.s32 0, %v1087_v31 }
  0x17   :  { %v982_v19 = vld [vmem:[%s1224_s1 + $0x138] sm:$0xff]  }
  0x18   :  { %839 = vmatpush3.bf16.msra.mxu0 %v941_v27  ;;  %v983_v21 = vld [vmem:[%s1224_s1 + $0x1b8] sm:$0xff]  }
  0x19   :  { %861 = vmatpush3.bf16.msra.mxu1 %v942_v28  ;;  %840 = vmatprep.subr.bf16.mxu0 %v943_v29 }
  0x1a   :  { %862 = vmatprep.subr.bf16.mxu1 %v944_v30 }
  0x1c   :  { %841 = vmatpush3.bf16.msra.mxu0 %v945_v33 }
  0x1d   :  { %863 = vmatpush3.bf16.msra.mxu1 %v946_v34  ;;  %842 = vmatprep.subr.bf16.mxu0 %v947_v35 }
  0x1e   :  { %864 = vmatprep.subr.bf16.mxu1 %v948_v36 }
  0x20   :  { %843 = vmatpush3.bf16.msra.mxu0 %v949_v38 }
  0x21   :  { %865 = vmatpush3.bf16.msra.mxu1 %v950_v39  ;;  %872 = vmatprep.subr.bf16.mxu0 %v952_v43 }
  0x22   :  { %894 = vmatprep.subr.bf16.mxu1 %v953_v44 }
  0x23   :  { %631 = vmatmul.mubr.bf16.vlgmr.msra.gmra.mrb[0].mxu0 %v180_v46 }
  0x24   :  { %873 = vmatpush3.bf16.msra.mxu0 %v954_v49  ;;  %671 = vmatmul.mubr.bf16.vlgmr.msra.gmra.mrb[0].mxu1 %v202_v51 }
  0x25   :  { %874 = vmatprep.subr.bf16.mxu0 %v956_v52  ;;  %895 = vmatpush3.bf16.msra.mxu1 %v955_v54 }
  0x26   :  { %710 = vmatprep.mubr.bf16.mxu0 %v201_v55  ;;  %896 = vmatprep.subr.bf16.mxu1 %v957_v56 }
  0x27   :  { %750 = vmatprep.mubr.bf16.mxu1 %v205_v58 }
  0x28   :  { %875 = vmatpush3.bf16.msra.mxu0 %v958_v57 }
  0x29   :  { %876 = vmatprep.subr.bf16.mxu0 %v960_v59  ;;  %897 = vmatpush3.bf16.msra.mxu1 %v959_v60 }
  0x2a   :  { %898 = vmatprep.subr.bf16.mxu1 %v961_v61 }
  0x2c   :  { %877 = vmatpush3.bf16.msra.mxu0 %v962_v62 }
  0x2d   :  { %878 = vmatprep.subr.bf16.mxu0 %v964_v63  ;;  %899 = vmatpush3.bf16.msra.mxu1 %v963_v0 }
  0x2e   :  { %900 = vmatprep.subr.bf16.mxu1 %v965_v1 }
  0x30   :  { %879 = vmatpush3.bf16.msra.mxu0 %v966_v2 }
  0x31   :  { %880 = vmatprep.subr.bf16.mxu0 %v968_v3  ;;  %901 = vmatpush3.bf16.msra.mxu1 %v967_v4 }
  0x32   :  { %902 = vmatprep.subr.bf16.mxu1 %v969_v5 }
  0x34   :  { %881 = vmatpush3.bf16.msra.mxu0 %v970_v6 }
  0x35   :  { %882 = vmatprep.subr.bf16.mxu0 %v972_v7  ;;  %903 = vmatpush3.bf16.msra.mxu1 %v971_v8 }
  0x36   :  { %904 = vmatprep.subr.bf16.mxu1 %v973_v9 }
  0x38   :  { %883 = vmatpush3.bf16.msra.mxu0 %v974_v10 }
  0x39   :  { %884 = vmatprep.subr.bf16.mxu0 %v976_v11  ;;  %905 = vmatpush3.bf16.msra.mxu1 %v975_v12 }
  0x3a   :  { %906 = vmatprep.subr.bf16.mxu1 %v977_v13 }
  0x3c   :  { %885 = vmatpush3.bf16.msra.mxu0 %v978_v14 }
  0x3d   :  { %886 = vmatprep.subr.bf16.mxu0 %v980_v15  ;;  %907 = vmatpush3.bf16.msra.mxu1 %v979_v16 }
  0x3e   :  { %908 = vmatprep.subr.bf16.mxu1 %v981_v17 }
  0x40   :  { %887 = vmatpush3.bf16.msra.mxu0 %v982_v19 }
  0x41   :  { %909 = vmatpush3.bf16.msra.mxu1 %v983_v21 }
  0x43   :  { %711 = vmatmul.mubr.bf16.vlgmr.msra.gmra.mrb[4].mxu0 %v187_v20 }
  0x44   :  { %751 = vmatmul.mubr.bf16.vlgmr.msra.gmra.mrb[4].mxu1 %v203_v22 }
  0x95   :  { %v150_v24 = vpop.permute.xlu0 %149 }
  0x96   :  { %v155_v26 = vrot.slane %v150_v24, %v154_v23 }
  0xf6   :  { %v844_v25 = vpop.f32.mrb[0].mxu0 }
  0xf7   :  { %v845_v27 = vpop.f32.mrb[1].mxu0  ;;  %v866_v28 = vpop.f32.mrb[0].mxu1 }
  0xf8   :  { %v846_v29 = vadd.f32 %v845_v27, %v844_v25  ;;  %v847_v30 = vpop.f32.mrb[2].mxu0  ;;  %v867_v32 = vpop.f32.mrb[1].mxu1 }
  0xf9   :  { %v848_v33 = vpop.f32.mrb[3].mxu0  ;;  %v868_v35 = vadd.f32 %v867_v32, %v866_v28  ;;  %v869_v36 = vpop.f32.mrb[2].mxu1 }
  0xfa   :  { %v633_v34 = vadd.f32 %v846_v29, %v155_v26  ;;  %v870_v37 = vpop.f32.mrb[3].mxu1 }
  0xfc   :  { %v673_v38 = vadd.f32 %v868_v35, %v633_v34 }
 0x116   :  { %v888_v39 = vpop.f32.mrb[4].mxu0 }
 0x117   :  { %v889_v40 = vpop.f32.mrb[5].mxu0  ;;  %v910_v41 = vpop.f32.mrb[4].mxu1 }
 0x118   :  { %v890_v42 = vadd.f32 %v889_v40, %v888_v39  ;;  %v891_v43 = vpop.f32.mrb[6].mxu0  ;;  %v911_v31 = vpop.f32.mrb[5].mxu1 }
 0x119   :  { %v892_v44 = vpop.f32.mrb[7].mxu0  ;;  %v912_v46 = vadd.f32 %v911_v31, %v910_v41  ;;  %v913_v47 = vpop.f32.mrb[6].mxu1 }
 0x11a   :  { %v713_v45 = vadd.f32 %v890_v42, %v673_v38  ;;  %v914_v48 = vpop.f32.mrb[7].mxu1 }
 0x11c   :  { %v753_v49 = vadd.f32 %v912_v46, %v713_v45 }
 0x11e   :  { %759 = vst.msk [vmem:[%s1227_s3] sm:$0x1] %vm758_vm0, %v753_v49 }

</bundles_post_ra>
